<compile_context>
chip_gen: v7x
topology: tpu7x:2x2x1
jax: 0.10.0
libtpu: 0.0.40
codegen_flags: <defaults>
</compile_context>

<pallas_src>
import jax
import jax.numpy as jnp
from jax.experimental import pallas as pl
from jax.experimental.pallas import tpu as pltpu


# -----------------------------------------------------------------------------
# Fused kernel: all LSTM layers (wavefronted) + last-timestep select + FC
# -----------------------------------------------------------------------------
def make_fused_lstm_kernel(num_layers, L, N, D, H, O, offs):
    """Kernel refs: x_ref (L*N, D) time-major rows, len_ref (N,1) int32,
    w_ref (rows, 4H) packed weight slab, out_ref (N, O)."""

    def lstm_cell(gates, c):
        # gates: (N, 4H) f32 pre-activations; g-gate columns were pre-scaled
        # by 2 at pack time, so tanh(z) == 2*sigmoid(2z) - 1 reuses the single
        # full-width sigmoid pass (one EUP pass per step instead of two).
        sig = jax.nn.sigmoid(gates)
        i_g = sig[:, 0:H]
        f_g = sig[:, H:2 * H]
        g_g = 2.0 * sig[:, 2 * H:3 * H] - 1.0
        o_g = sig[:, 3 * H:4 * H]
        c_new = f_g * c + i_g * g_g
        h_new = o_g * jnp.tanh(c_new)
        return h_new, c_new

    def kernel(x_ref, len_ref, w_ref, out_ref):
        bf16 = jnp.bfloat16
        lens_m1 = len_ref[...] - 1                       # (N, 1) int32
        x = x_ref[...]                                   # (L*N, D) f32

        # One-time weight loads / bf16 casts (hoisted out of the recurrence).
        wih0 = w_ref[offs["wih0"]:offs["wih0"] + D, :].astype(bf16)   # (D, 4H)
        whh0 = w_ref[offs["whh0"]:offs["whh0"] + H, :].astype(bf16)   # (H, 4H)
        b0 = w_ref[offs["b0"]:offs["b0"] + 1, :]                      # (1, 4H) f32
        wcat, bs = [], []
        for l in range(1, num_layers):
            ow, ob = offs[f"wcat{l}"], offs[f"b{l}"]
            wcat.append(w_ref[ow:ow + 2 * H, :].astype(bf16))         # (2H, 4H)
            bs.append(w_ref[ob:ob + 1, :])                            # (1, 4H) f32
        fcw = w_ref[offs["fcw"]:offs["fcw"] + H, :].astype(bf16)      # (H, 4H) padded
        fcb = w_ref[offs["fcb"]:offs["fcb"] + 1, :]                   # (1, 4H) padded

        # cuDNN-style hoist: layer-0 input projection for ALL timesteps in one
        # lane-dense bf16 MXU pass; only h @ W_hh stays on the serial path.
        xproj0 = jnp.dot(x.astype(bf16), wih0,
                         preferred_element_type=jnp.float32) + b0     # (L*N, 4H)

        # Wavefront recurrence: time outermost, layers advanced inside, so the
        # scheduler can overlap layer l-1 step t+1 with layer l step t.
        h = [jnp.zeros((N, H), jnp.float32) for _ in range(num_layers)]
        c = [jnp.zeros((N, H), jnp.float32) for _ in range(num_layers)]
        last = jnp.zeros((N, H), jnp.float32)

        for t in range(L):                       # static L: full unroll
            g0 = xproj0[t * N:(t + 1) * N, :] + jnp.dot(
                h[0].astype(bf16), whh0, preferred_element_type=jnp.float32)
            h[0], c[0] = lstm_cell(g0, c[0])
            for l in range(1, num_layers):
                # Fused input+hidden projection: single (N,2H)@(2H,4H) push.
                inp = jnp.concatenate([h[l - 1], h[l]], axis=-1).astype(bf16)
                gl = jnp.dot(inp, wcat[l - 1],
                             preferred_element_type=jnp.float32) + bs[l - 1]
                h[l], c[l] = lstm_cell(gl, c[l])
            # last_by_index: keep top-layer h where t == lengths - 1
            last = jnp.where(lens_m1 == t, h[num_layers - 1], last)

        # Fused final Linear (FC padded to 4H lanes; take first O columns).
        out = jnp.dot(last.astype(bf16), fcw,
                      preferred_element_type=jnp.float32) + fcb        # (N, 4H)
        out_ref[...] = out[:, :O].astype(out_ref.dtype)

    return kernel


# -----------------------------------------------------------------------------
# Wrapper
# -----------------------------------------------------------------------------
def make_fused_lstm_forward(num_layers, L, N, D, H, O, offs, slab_rows):
    G = 4 * H
    kernel = make_fused_lstm_kernel(num_layers, L, N, D, H, O, offs)

    @jax.jit
    def forward(x, lengths, slab):
        # Time-major rows so the in-kernel per-timestep slice is contiguous
        # and sublane-aligned (multiples of N=8 rows).
        x_rows = jnp.transpose(x, (1, 0, 2)).reshape(L * N, D)
        lens2d = lengths.reshape(-1, 1).astype(jnp.int32)
        return pl.pallas_call(
            kernel,
            out_shape=jax.ShapeDtypeStruct((N, O), jnp.float32),
            grid=(1,),
            in_specs=[
                pl.BlockSpec((L * N, D), lambda i: (0, 0)),
                pl.BlockSpec((N, 1), lambda i: (0, 0)),
                pl.BlockSpec((slab_rows, G), lambda i: (0, 0)),
            ],
            out_specs=pl.BlockSpec((N, O), lambda i: (0, 0)),
            compiler_params=pltpu.CompilerParams(
                dimension_semantics=("arbitrary",)),
        )(x_rows, lens2d, slab)

    return forward


# -----------------------------------------------------------------------------
# Parameter packing: one (rows, 4H) f32 slab, 8-row-aligned blocks,
# g-gate columns pre-scaled by 2 (for the 2*sigmoid(2z)-1 == tanh(z) trick).
# -----------------------------------------------------------------------------
def pack_params(params, D, H, O, num_layers):
    G = 4 * H
    blocks, offsets = [], {}
    row = 0

    def scale_g(w):                       # (*, 4H): double the g-gate columns
        return w.at[:, 2 * H:3 * H].multiply(2.0)

    def add(name, arr):
        nonlocal row
        r = -(-arr.shape[0] // 8) * 8     # pad rows up to a multiple of 8
        pad = r - arr.shape[0]
        if pad:
            arr = jnp.concatenate(
                [arr, jnp.zeros((pad, arr.shape[1]), arr.dtype)], axis=0)
        blocks.append(arr)
        offsets[name] = row
        row += r

    wih0, whh0, b0 = params["lstm"][0]
    add("wih0", scale_g(wih0))                                   # (D, 4H)
    add("whh0", scale_g(whh0))                                   # (H, 4H)
    add("b0", scale_g(b0))                                       # (1, 4H)
    for l in range(1, num_layers):
        wih, whh, b = params["lstm"][l]
        add(f"wcat{l}", scale_g(jnp.concatenate([wih, whh], axis=0)))  # (2H,4H)
        add(f"b{l}", scale_g(b))                                 # (1, 4H)
    fcw_p = jnp.zeros((H, G), jnp.float32).at[:, :O].set(params["fc_w_t"])
    fcb_p = jnp.zeros((1, G), jnp.float32).at[:, :O].set(params["fc_b"])
    add("fcw", fcw_p)
    add("fcb", fcb_p)

    slab = jnp.concatenate(blocks, axis=0)                       # (rows, 4H)
    return slab, offsets, row


# -----------------------------------------------------------------------------
# Deterministic parameter init (shapes as in nn.LSTM / nn.Linear)
# -----------------------------------------------------------------------------
def init_params(key, input_dim, rnn_size, output_dim, num_layers):
    H = rnn_size
    k_lstm = 1.0 / jnp.sqrt(jnp.float32(H))
    lstm_params = []
    din = input_dim
    for _ in range(num_layers):
        key, k1, k2, k3, k4 = jax.random.split(key, 5)
        w_ih = jax.random.uniform(k1, (4 * H, din), jnp.float32, -k_lstm, k_lstm)
        w_hh = jax.random.uniform(k2, (4 * H, H), jnp.float32, -k_lstm, k_lstm)
        b_ih = jax.random.uniform(k3, (4 * H,), jnp.float32, -k_lstm, k_lstm)
        b_hh = jax.random.uniform(k4, (4 * H,), jnp.float32, -k_lstm, k_lstm)
        lstm_params.append((w_ih.T, w_hh.T, (b_ih + b_hh).reshape(1, 4 * H)))
        din = H

    feature_size = H  # unidirectional
    k_fc = 1.0 / jnp.sqrt(jnp.float32(feature_size))
    key, k5, k6 = jax.random.split(key, 3)
    fc_w = jax.random.uniform(k5, (output_dim, feature_size), jnp.float32, -k_fc, k_fc)
    fc_b = jax.random.uniform(k6, (output_dim,), jnp.float32, -k_fc, k_fc)
    return {"lstm": lstm_params,
            "fc_w_t": fc_w.T,
            "fc_b": fc_b.reshape(1, output_dim)}


# -----------------------------------------------------------------------------
# Pure-JAX reference (same math as the torch forward, unidirectional).
# matmul_dtype=bfloat16 mirrors the kernel's MXU operand precision.
# -----------------------------------------------------------------------------
def reference_forward(x, lengths, params, matmul_dtype=jnp.float32):
    prec = jax.lax.Precision.HIGHEST if matmul_dtype == jnp.float32 else None

    def mm(a, b):
        return jnp.dot(a.astype(matmul_dtype), b.astype(matmul_dtype),
                       preferred_element_type=jnp.float32, precision=prec)

    N, L, _ = x.shape
    xt = x
    for (wih_t, whh_t, b) in params["lstm"]:
        H = whh_t.shape[0]
        h = jnp.zeros((N, H), jnp.float32)
        c = jnp.zeros((N, H), jnp.float32)
        ys = []
        for t in range(L):
            g = mm(xt[:, t, :], wih_t) + mm(h, whh_t) + b
            i_g = jax.nn.sigmoid(g[:, :H])
            f_g = jax.nn.sigmoid(g[:, H:2 * H])
            g_g = jnp.tanh(g[:, 2 * H:3 * H])
            o_g = jax.nn.sigmoid(g[:, 3 * H:])
            c = f_g * c + i_g * g_g
            h = o_g * jnp.tanh(c)
            ys.append(h)
        xt = jnp.stack(ys, axis=1)
    last = xt[jnp.arange(N), lengths - 1, :]
    return mm(last, params["fc_w_t"]) + params["fc_b"]


# -----------------------------------------------------------------------------
if __name__ == "__main__":
    # Small config consistent with the module's forward(): x (N, L, D), lengths (N,)
    N, L, D = 8, 8, 16
    rnn_size, output_dim, num_layers = 32, 8, 2
    H, O = rnn_size, output_dim

    key = jax.random.PRNGKey(0)
    key, kx, kp = jax.random.split(key, 3)
    x = jax.random.normal(kx, (N, L, D), jnp.float32)
    lengths = jnp.array([8, 5, 3, 8, 1, 7, 4, 6], dtype=jnp.int32)
    assert int(lengths.min()) >= 1 and int(lengths.max()) <= L  # gather contract

    params = init_params(kp, D, H, O, num_layers)
    slab, offs, slab_rows = pack_params(params, D, H, O, num_layers)

    forward = make_fused_lstm_forward(num_layers, L, N, D, H, O, offs, slab_rows)
    out = jax.block_until_ready(forward(x, lengths, slab))
    assert out.shape == (N, O), out.shape

    # Tight structural check vs a JAX reference using the same bf16 MXU operands.
    ref_bf16 = reference_forward(x, lengths, params, matmul_dtype=jnp.bfloat16)
    err_b = float(jnp.max(jnp.abs(out - ref_bf16)))
    assert jnp.allclose(out, ref_bf16, rtol=1e-2, atol=1e-3), ("bf16-ref mismatch", err_b)

    # Loose check vs full-f32 PyTorch-equivalent math (only bf16 MXU rounding apart).
    ref_f32 = reference_forward(x, lengths, params, matmul_dtype=jnp.float32)
    err_f = float(jnp.max(jnp.abs(out - ref_f32)))
    assert jnp.allclose(out, ref_f32, rtol=5e-2, atol=5e-2), ("f32-ref mismatch", err_f)

    print("KERNEL_OK")
</pallas_src>

<mosaic_0001>
module attributes {stable_mosaic.version = 11 : i64} {
  func.func @kernel(%arg0: i32, %arg1: memref<64x16xf32, #tpu.memory_space<vmem>>, %arg2: memref<8x1xi32, #tpu.memory_space<vmem>>, %arg3: memref<168x128xf32, #tpu.memory_space<vmem>>, %arg4: memref<8x8xf32, #tpu.memory_space<vmem>>) attributes {dimension_semantics = [#tpu.dimension_semantics<arbitrary>], iteration_bounds = array<i64: 1>, scalar_prefetch = 0 : i64, scratch_operands = 0 : i64, tpu.core_type = #tpu.core_type<tc>, window_params = [{pipeline_mode = #tpu.pipeline_mode<synchronous>, transform_indices = @transform_0, window_bounds = array<i64: 64, 16>}, {pipeline_mode = #tpu.pipeline_mode<synchronous>, transform_indices = @transform_1, window_bounds = array<i64: 8, 1>}, {pipeline_mode = #tpu.pipeline_mode<synchronous>, transform_indices = @transform_2, window_bounds = array<i64: 168, 128>}, {pipeline_mode = #tpu.pipeline_mode<synchronous>, transform_indices = @transform_3, window_bounds = array<i64: 8, 8>}]} {
    %c0 = arith.constant 0 : index
    %c0_0 = arith.constant 0 : index
    %0 = vector.load %arg2[%c0, %c0_0] : memref<8x1xi32, #tpu.memory_space<vmem>>, vector<8x1xi32>
    %c1_i32 = arith.constant 1 : i32
    %1 = vector.broadcast %c1_i32 : i32 to vector<8x1xi32>
    %2 = arith.subi %0, %1 : vector<8x1xi32>
    %c0_1 = arith.constant 0 : index
    %c0_2 = arith.constant 0 : index
    %3 = vector.load %arg1[%c0_1, %c0_2] : memref<64x16xf32, #tpu.memory_space<vmem>>, vector<64x16xf32>
    %c0_3 = arith.constant 0 : index
    %c0_4 = arith.constant 0 : index
    %4 = vector.load %arg3[%c0_3, %c0_4] : memref<168x128xf32, #tpu.memory_space<vmem>>, vector<16x128xf32>
    %5 = arith.truncf %4 : vector<16x128xf32> to vector<16x128xbf16>
    %c16 = arith.constant 16 : index
    %c0_5 = arith.constant 0 : index
    %6 = vector.load %arg3[%c16, %c0_5] : memref<168x128xf32, #tpu.memory_space<vmem>>, vector<32x128xf32>
    %7 = arith.truncf %6 : vector<32x128xf32> to vector<32x128xbf16>
    %c48 = arith.constant 48 : index
    %c0_6 = arith.constant 0 : index
    %8 = vector.load %arg3[%c48, %c0_6] : memref<168x128xf32, #tpu.memory_space<vmem>>, vector<1x128xf32>
    %c56 = arith.constant 56 : index
    %c0_7 = arith.constant 0 : index
    %9 = vector.load %arg3[%c56, %c0_7] : memref<168x128xf32, #tpu.memory_space<vmem>>, vector<64x128xf32>
    %10 = arith.truncf %9 : vector<64x128xf32> to vector<64x128xbf16>
    %c120 = arith.constant 120 : index
    %c0_8 = arith.constant 0 : index
    %11 = vector.load %arg3[%c120, %c0_8] : memref<168x128xf32, #tpu.memory_space<vmem>>, vector<1x128xf32>
    %c128 = arith.constant 128 : index
    %c0_9 = arith.constant 0 : index
    %12 = vector.load %arg3[%c128, %c0_9] : memref<168x128xf32, #tpu.memory_space<vmem>>, vector<32x128xf32>
    %13 = arith.truncf %12 : vector<32x128xf32> to vector<32x128xbf16>
    %c160 = arith.constant 160 : index
    %c0_10 = arith.constant 0 : index
    %14 = vector.load %arg3[%c160, %c0_10] : memref<168x128xf32, #tpu.memory_space<vmem>>, vector<1x128xf32>
    %15 = arith.truncf %3 : vector<64x16xf32> to vector<64x16xbf16>
    %cst = arith.constant dense<0.000000e+00> : vector<64x128xf32>
    %16 = tpu.matmul %15, %5, %cst {dimension_numbers = #tpu.dot_dimension_numbers<[1], [0], [0], [1], [0, 0, 1, 1], [], []>} : vector<64x16xbf16>, vector<16x128xbf16>, vector<64x128xf32> -> vector<64x128xf32>
    %17 = vector.broadcast %8 : vector<1x128xf32> to vector<64x128xf32>
    %18 = arith.addf %16, %17 : vector<64x128xf32>
    %cst_11 = arith.constant 0.000000e+00 : f32
    %19 = vector.broadcast %cst_11 : f32 to vector<8x32xf32>
    %cst_12 = arith.constant 0.000000e+00 : f32
    %20 = vector.broadcast %cst_12 : f32 to vector<8x32xf32>
    %cst_13 = arith.constant 0.000000e+00 : f32
    %21 = vector.broadcast %cst_13 : f32 to vector<8x32xf32>
    %cst_14 = arith.constant 0.000000e+00 : f32
    %22 = vector.broadcast %cst_14 : f32 to vector<8x32xf32>
    %cst_15 = arith.constant 0.000000e+00 : f32
    %23 = vector.broadcast %cst_15 : f32 to vector<8x32xf32>
    %24 = vector.extract_strided_slice %18 {offsets = [0, 0], sizes = [8, 128], strides = [1, 1]} : vector<64x128xf32> to vector<8x128xf32>
    %25 = arith.truncf %19 : vector<8x32xf32> to vector<8x32xbf16>
    %cst_16 = arith.constant dense<0.000000e+00> : vector<8x128xf32>
    %26 = tpu.matmul %25, %7, %cst_16 {dimension_numbers = #tpu.dot_dimension_numbers<[1], [0], [0], [1], [0, 0, 1, 1], [], []>} : vector<8x32xbf16>, vector<32x128xbf16>, vector<8x128xf32> -> vector<8x128xf32>
    %27 = arith.addf %24, %26 : vector<8x128xf32>
    %28 = arith.negf %27 : vector<8x128xf32>
    %29 = math.exp %28 : vector<8x128xf32>
    %cst_17 = arith.constant 1.000000e+00 : f32
    %30 = vector.broadcast %cst_17 : f32 to vector<8x128xf32>
    %31 = arith.addf %30, %29 : vector<8x128xf32>
    %32 = arith.divf %30, %31 : vector<8x128xf32>
    %33 = vector.extract_strided_slice %32 {offsets = [0, 0], sizes = [8, 32], strides = [1, 1]} : vector<8x128xf32> to vector<8x32xf32>
    %34 = vector.extract_strided_slice %32 {offsets = [0, 32], sizes = [8, 32], strides = [1, 1]} : vector<8x128xf32> to vector<8x32xf32>
    %35 = vector.extract_strided_slice %32 {offsets = [0, 64], sizes = [8, 32], strides = [1, 1]} : vector<8x128xf32> to vector<8x32xf32>
    %cst_18 = arith.constant 2.000000e+00 : f32
    %36 = vector.broadcast %cst_18 : f32 to vector<8x32xf32>
    %37 = arith.mulf %36, %35 : vector<8x32xf32>
    %cst_19 = arith.constant 1.000000e+00 : f32
    %38 = vector.broadcast %cst_19 : f32 to vector<8x32xf32>
    %39 = arith.subf %37, %38 : vector<8x32xf32>
    %40 = vector.extract_strided_slice %32 {offsets = [0, 96], sizes = [8, 32], strides = [1, 1]} : vector<8x128xf32> to vector<8x32xf32>
    %41 = arith.mulf %34, %21 : vector<8x32xf32>
    %42 = arith.mulf %33, %39 : vector<8x32xf32>
    %43 = arith.addf %41, %42 : vector<8x32xf32>
    %44 = math.tanh %43 : vector<8x32xf32>
    %45 = arith.mulf %40, %44 : vector<8x32xf32>
    %46 = tpu.concatenate %45, %20 in 1 : vector<8x32xf32>, vector<8x32xf32> -> vector<8x64xf32>
    %47 = arith.truncf %46 : vector<8x64xf32> to vector<8x64xbf16>
    %cst_20 = arith.constant dense<0.000000e+00> : vector<8x128xf32>
    %48 = tpu.matmul %47, %10, %cst_20 {dimension_numbers = #tpu.dot_dimension_numbers<[1], [0], [0], [1], [0, 0, 1, 1], [], []>} : vector<8x64xbf16>, vector<64x128xbf16>, vector<8x128xf32> -> vector<8x128xf32>
    %49 = vector.broadcast %11 : vector<1x128xf32> to vector<8x128xf32>
    %50 = arith.addf %48, %49 : vector<8x128xf32>
    %51 = arith.negf %50 : vector<8x128xf32>
    %52 = math.exp %51 : vector<8x128xf32>
    %cst_21 = arith.constant 1.000000e+00 : f32
    %53 = vector.broadcast %cst_21 : f32 to vector<8x128xf32>
    %54 = arith.addf %53, %52 : vector<8x128xf32>
    %55 = arith.divf %53, %54 : vector<8x128xf32>
    %56 = vector.extract_strided_slice %55 {offsets = [0, 0], sizes = [8, 32], strides = [1, 1]} : vector<8x128xf32> to vector<8x32xf32>
    %57 = vector.extract_strided_slice %55 {offsets = [0, 32], sizes = [8, 32], strides = [1, 1]} : vector<8x128xf32> to vector<8x32xf32>
    %58 = vector.extract_strided_slice %55 {offsets = [0, 64], sizes = [8, 32], strides = [1, 1]} : vector<8x128xf32> to vector<8x32xf32>
    %cst_22 = arith.constant 2.000000e+00 : f32
    %59 = vector.broadcast %cst_22 : f32 to vector<8x32xf32>
    %60 = arith.mulf %59, %58 : vector<8x32xf32>
    %cst_23 = arith.constant 1.000000e+00 : f32
    %61 = vector.broadcast %cst_23 : f32 to vector<8x32xf32>
    %62 = arith.subf %60, %61 : vector<8x32xf32>
    %63 = vector.extract_strided_slice %55 {offsets = [0, 96], sizes = [8, 32], strides = [1, 1]} : vector<8x128xf32> to vector<8x32xf32>
    %64 = arith.mulf %57, %22 : vector<8x32xf32>
    %65 = arith.mulf %56, %62 : vector<8x32xf32>
    %66 = arith.addf %64, %65 : vector<8x32xf32>
    %67 = math.tanh %66 : vector<8x32xf32>
    %68 = arith.mulf %63, %67 : vector<8x32xf32>
    %c0_i32 = arith.constant 0 : i32
    %69 = vector.broadcast %c0_i32 : i32 to vector<8x1xi32>
    %70 = arith.cmpi eq, %2, %69 : vector<8x1xi32>
    %71 = vector.shape_cast %70 : vector<8x1xi1> to vector<8x1xi1>
    %72 = vector.broadcast %71 : vector<8x1xi1> to vector<8x32xi1>
    %73 = arith.select %72, %68, %23 : vector<8x32xi1>, vector<8x32xf32>
    %74 = vector.extract_strided_slice %18 {offsets = [8, 0], sizes = [8, 128], strides = [1, 1]} : vector<64x128xf32> to vector<8x128xf32>
    %75 = arith.truncf %45 : vector<8x32xf32> to vector<8x32xbf16>
    %cst_24 = arith.constant dense<0.000000e+00> : vector<8x128xf32>
    %76 = tpu.matmul %75, %7, %cst_24 {dimension_numbers = #tpu.dot_dimension_numbers<[1], [0], [0], [1], [0, 0, 1, 1], [], []>} : vector<8x32xbf16>, vector<32x128xbf16>, vector<8x128xf32> -> vector<8x128xf32>
    %77 = arith.addf %74, %76 : vector<8x128xf32>
    %78 = arith.negf %77 : vector<8x128xf32>
    %79 = math.exp %78 : vector<8x128xf32>
    %cst_25 = arith.constant 1.000000e+00 : f32
    %80 = vector.broadcast %cst_25 : f32 to vector<8x128xf32>
    %81 = arith.addf %80, %79 : vector<8x128xf32>
    %82 = arith.divf %80, %81 : vector<8x128xf32>
    %83 = vector.extract_strided_slice %82 {offsets = [0, 0], sizes = [8, 32], strides = [1, 1]} : vector<8x128xf32> to vector<8x32xf32>
    %84 = vector.extract_strided_slice %82 {offsets = [0, 32], sizes = [8, 32], strides = [1, 1]} : vector<8x128xf32> to vector<8x32xf32>
    %85 = vector.extract_strided_slice %82 {offsets = [0, 64], sizes = [8, 32], strides = [1, 1]} : vector<8x128xf32> to vector<8x32xf32>
    %cst_26 = arith.constant 2.000000e+00 : f32
    %86 = vector.broadcast %cst_26 : f32 to vector<8x32xf32>
    %87 = arith.mulf %86, %85 : vector<8x32xf32>
    %cst_27 = arith.constant 1.000000e+00 : f32
    %88 = vector.broadcast %cst_27 : f32 to vector<8x32xf32>
    %89 = arith.subf %87, %88 : vector<8x32xf32>
    %90 = vector.extract_strided_slice %82 {offsets = [0, 96], sizes = [8, 32], strides = [1, 1]} : vector<8x128xf32> to vector<8x32xf32>
    %91 = arith.mulf %84, %43 : vector<8x32xf32>
    %92 = arith.mulf %83, %89 : vector<8x32xf32>
    %93 = arith.addf %91, %92 : vector<8x32xf32>
    %94 = math.tanh %93 : vector<8x32xf32>
    %95 = arith.mulf %90, %94 : vector<8x32xf32>
    %96 = tpu.concatenate %95, %68 in 1 : vector<8x32xf32>, vector<8x32xf32> -> vector<8x64xf32>
    %97 = arith.truncf %96 : vector<8x64xf32> to vector<8x64xbf16>
    %cst_28 = arith.constant dense<0.000000e+00> : vector<8x128xf32>
    %98 = tpu.matmul %97, %10, %cst_28 {dimension_numbers = #tpu.dot_dimension_numbers<[1], [0], [0], [1], [0, 0, 1, 1], [], []>} : vector<8x64xbf16>, vector<64x128xbf16>, vector<8x128xf32> -> vector<8x128xf32>
    %99 = vector.broadcast %11 : vector<1x128xf32> to vector<8x128xf32>
    %100 = arith.addf %98, %99 : vector<8x128xf32>
    %101 = arith.negf %100 : vector<8x128xf32>
    %102 = math.exp %101 : vector<8x128xf32>
    %cst_29 = arith.constant 1.000000e+00 : f32
    %103 = vector.broadcast %cst_29 : f32 to vector<8x128xf32>
    %104 = arith.addf %103, %102 : vector<8x128xf32>
    %105 = arith.divf %103, %104 : vector<8x128xf32>
    %106 = vector.extract_strided_slice %105 {offsets = [0, 0], sizes = [8, 32], strides = [1, 1]} : vector<8x128xf32> to vector<8x32xf32>
    %107 = vector.extract_strided_slice %105 {offsets = [0, 32], sizes = [8, 32], strides = [1, 1]} : vector<8x128xf32> to vector<8x32xf32>
    %108 = vector.extract_strided_slice %105 {offsets = [0, 64], sizes = [8, 32], strides = [1, 1]} : vector<8x128xf32> to vector<8x32xf32>
    %cst_30 = arith.constant 2.000000e+00 : f32
    %109 = vector.broadcast %cst_30 : f32 to vector<8x32xf32>
    %110 = arith.mulf %109, %108 : vector<8x32xf32>
    %cst_31 = arith.constant 1.000000e+00 : f32
    %111 = vector.broadcast %cst_31 : f32 to vector<8x32xf32>
    %112 = arith.subf %110, %111 : vector<8x32xf32>
    %113 = vector.extract_strided_slice %105 {offsets = [0, 96], sizes = [8, 32], strides = [1, 1]} : vector<8x128xf32> to vector<8x32xf32>
    %114 = arith.mulf %107, %66 : vector<8x32xf32>
    %115 = arith.mulf %106, %112 : vector<8x32xf32>
    %116 = arith.addf %114, %115 : vector<8x32xf32>
    %117 = math.tanh %116 : vector<8x32xf32>
    %118 = arith.mulf %113, %117 : vector<8x32xf32>
    %c1_i32_32 = arith.constant 1 : i32
    %119 = vector.broadcast %c1_i32_32 : i32 to vector<8x1xi32>
    %120 = arith.cmpi eq, %2, %119 : vector<8x1xi32>
    %121 = vector.shape_cast %120 : vector<8x1xi1> to vector<8x1xi1>
    %122 = vector.broadcast %121 : vector<8x1xi1> to vector<8x32xi1>
    %123 = arith.select %122, %118, %73 : vector<8x32xi1>, vector<8x32xf32>
    %124 = vector.extract_strided_slice %18 {offsets = [16, 0], sizes = [8, 128], strides = [1, 1]} : vector<64x128xf32> to vector<8x128xf32>
    %125 = arith.truncf %95 : vector<8x32xf32> to vector<8x32xbf16>
    %cst_33 = arith.constant dense<0.000000e+00> : vector<8x128xf32>
    %126 = tpu.matmul %125, %7, %cst_33 {dimension_numbers = #tpu.dot_dimension_numbers<[1], [0], [0], [1], [0, 0, 1, 1], [], []>} : vector<8x32xbf16>, vector<32x128xbf16>, vector<8x128xf32> -> vector<8x128xf32>
    %127 = arith.addf %124, %126 : vector<8x128xf32>
    %128 = arith.negf %127 : vector<8x128xf32>
    %129 = math.exp %128 : vector<8x128xf32>
    %cst_34 = arith.constant 1.000000e+00 : f32
    %130 = vector.broadcast %cst_34 : f32 to vector<8x128xf32>
    %131 = arith.addf %130, %129 : vector<8x128xf32>
    %132 = arith.divf %130, %131 : vector<8x128xf32>
    %133 = vector.extract_strided_slice %132 {offsets = [0, 0], sizes = [8, 32], strides = [1, 1]} : vector<8x128xf32> to vector<8x32xf32>
    %134 = vector.extract_strided_slice %132 {offsets = [0, 32], sizes = [8, 32], strides = [1, 1]} : vector<8x128xf32> to vector<8x32xf32>
    %135 = vector.extract_strided_slice %132 {offsets = [0, 64], sizes = [8, 32], strides = [1, 1]} : vector<8x128xf32> to vector<8x32xf32>
    %cst_35 = arith.constant 2.000000e+00 : f32
    %136 = vector.broadcast %cst_35 : f32 to vector<8x32xf32>
    %137 = arith.mulf %136, %135 : vector<8x32xf32>
    %cst_36 = arith.constant 1.000000e+00 : f32
    %138 = vector.broadcast %cst_36 : f32 to vector<8x32xf32>
    %139 = arith.subf %137, %138 : vector<8x32xf32>
    %140 = vector.extract_strided_slice %132 {offsets = [0, 96], sizes = [8, 32], strides = [1, 1]} : vector<8x128xf32> to vector<8x32xf32>
    %141 = arith.mulf %134, %93 : vector<8x32xf32>
    %142 = arith.mulf %133, %139 : vector<8x32xf32>
    %143 = arith.addf %141, %142 : vector<8x32xf32>
    %144 = math.tanh %143 : vector<8x32xf32>
    %145 = arith.mulf %140, %144 : vector<8x32xf32>
    %146 = tpu.concatenate %145, %118 in 1 : vector<8x32xf32>, vector<8x32xf32> -> vector<8x64xf32>
    %147 = arith.truncf %146 : vector<8x64xf32> to vector<8x64xbf16>
    %cst_37 = arith.constant dense<0.000000e+00> : vector<8x128xf32>
    %148 = tpu.matmul %147, %10, %cst_37 {dimension_numbers = #tpu.dot_dimension_numbers<[1], [0], [0], [1], [0, 0, 1, 1], [], []>} : vector<8x64xbf16>, vector<64x128xbf16>, vector<8x128xf32> -> vector<8x128xf32>
    %149 = vector.broadcast %11 : vector<1x128xf32> to vector<8x128xf32>
    %150 = arith.addf %148, %149 : vector<8x128xf32>
    %151 = arith.negf %150 : vector<8x128xf32>
    %152 = math.exp %151 : vector<8x128xf32>
    %cst_38 = arith.constant 1.000000e+00 : f32
    %153 = vector.broadcast %cst_38 : f32 to vector<8x128xf32>
    %154 = arith.addf %153, %152 : vector<8x128xf32>
    %155 = arith.divf %153, %154 : vector<8x128xf32>
    %156 = vector.extract_strided_slice %155 {offsets = [0, 0], sizes = [8, 32], strides = [1, 1]} : vector<8x128xf32> to vector<8x32xf32>
    %157 = vector.extract_strided_slice %155 {offsets = [0, 32], sizes = [8, 32], strides = [1, 1]} : vector<8x128xf32> to vector<8x32xf32>
    %158 = vector.extract_strided_slice %155 {offsets = [0, 64], sizes = [8, 32], strides = [1, 1]} : vector<8x128xf32> to vector<8x32xf32>
    %cst_39 = arith.constant 2.000000e+00 : f32
    %159 = vector.broadcast %cst_39 : f32 to vector<8x32xf32>
    %160 = arith.mulf %159, %158 : vector<8x32xf32>
    %cst_40 = arith.constant 1.000000e+00 : f32
    %161 = vector.broadcast %cst_40 : f32 to vector<8x32xf32>
    %162 = arith.subf %160, %161 : vector<8x32xf32>
    %163 = vector.extract_strided_slice %155 {offsets = [0, 96], sizes = [8, 32], strides = [1, 1]} : vector<8x128xf32> to vector<8x32xf32>
    %164 = arith.mulf %157, %116 : vector<8x32xf32>
    %165 = arith.mulf %156, %162 : vector<8x32xf32>
    %166 = arith.addf %164, %165 : vector<8x32xf32>
    %167 = math.tanh %166 : vector<8x32xf32>
    %168 = arith.mulf %163, %167 : vector<8x32xf32>
    %c2_i32 = arith.constant 2 : i32
    %169 = vector.broadcast %c2_i32 : i32 to vector<8x1xi32>
    %170 = arith.cmpi eq, %2, %169 : vector<8x1xi32>
    %171 = vector.shape_cast %170 : vector<8x1xi1> to vector<8x1xi1>
    %172 = vector.broadcast %171 : vector<8x1xi1> to vector<8x32xi1>
    %173 = arith.select %172, %168, %123 : vector<8x32xi1>, vector<8x32xf32>
    %174 = vector.extract_strided_slice %18 {offsets = [24, 0], sizes = [8, 128], strides = [1, 1]} : vector<64x128xf32> to vector<8x128xf32>
    %175 = arith.truncf %145 : vector<8x32xf32> to vector<8x32xbf16>
    %cst_41 = arith.constant dense<0.000000e+00> : vector<8x128xf32>
    %176 = tpu.matmul %175, %7, %cst_41 {dimension_numbers = #tpu.dot_dimension_numbers<[1], [0], [0], [1], [0, 0, 1, 1], [], []>} : vector<8x32xbf16>, vector<32x128xbf16>, vector<8x128xf32> -> vector<8x128xf32>
    %177 = arith.addf %174, %176 : vector<8x128xf32>
    %178 = arith.negf %177 : vector<8x128xf32>
    %179 = math.exp %178 : vector<8x128xf32>
    %cst_42 = arith.constant 1.000000e+00 : f32
    %180 = vector.broadcast %cst_42 : f32 to vector<8x128xf32>
    %181 = arith.addf %180, %179 : vector<8x128xf32>
    %182 = arith.divf %180, %181 : vector<8x128xf32>
    %183 = vector.extract_strided_slice %182 {offsets = [0, 0], sizes = [8, 32], strides = [1, 1]} : vector<8x128xf32> to vector<8x32xf32>
    %184 = vector.extract_strided_slice %182 {offsets = [0, 32], sizes = [8, 32], strides = [1, 1]} : vector<8x128xf32> to vector<8x32xf32>
    %185 = vector.extract_strided_slice %182 {offsets = [0, 64], sizes = [8, 32], strides = [1, 1]} : vector<8x128xf32> to vector<8x32xf32>
    %cst_43 = arith.constant 2.000000e+00 : f32
    %186 = vector.broadcast %cst_43 : f32 to vector<8x32xf32>
    %187 = arith.mulf %186, %185 : vector<8x32xf32>
    %cst_44 = arith.constant 1.000000e+00 : f32
    %188 = vector.broadcast %cst_44 : f32 to vector<8x32xf32>
    %189 = arith.subf %187, %188 : vector<8x32xf32>
    %190 = vector.extract_strided_slice %182 {offsets = [0, 96], sizes = [8, 32], strides = [1, 1]} : vector<8x128xf32> to vector<8x32xf32>
    %191 = arith.mulf %184, %143 : vector<8x32xf32>
    %192 = arith.mulf %183, %189 : vector<8x32xf32>
    %193 = arith.addf %191, %192 : vector<8x32xf32>
    %194 = math.tanh %193 : vector<8x32xf32>
    %195 = arith.mulf %190, %194 : vector<8x32xf32>
    %196 = tpu.concatenate %195, %168 in 1 : vector<8x32xf32>, vector<8x32xf32> -> vector<8x64xf32>
    %197 = arith.truncf %196 : vector<8x64xf32> to vector<8x64xbf16>
    %cst_45 = arith.constant dense<0.000000e+00> : vector<8x128xf32>
    %198 = tpu.matmul %197, %10, %cst_45 {dimension_numbers = #tpu.dot_dimension_numbers<[1], [0], [0], [1], [0, 0, 1, 1], [], []>} : vector<8x64xbf16>, vector<64x128xbf16>, vector<8x128xf32> -> vector<8x128xf32>
    %199 = vector.broadcast %11 : vector<1x128xf32> to vector<8x128xf32>
    %200 = arith.addf %198, %199 : vector<8x128xf32>
    %201 = arith.negf %200 : vector<8x128xf32>
    %202 = math.exp %201 : vector<8x128xf32>
    %cst_46 = arith.constant 1.000000e+00 : f32
    %203 = vector.broadcast %cst_46 : f32 to vector<8x128xf32>
    %204 = arith.addf %203, %202 : vector<8x128xf32>
    %205 = arith.divf %203, %204 : vector<8x128xf32>
    %206 = vector.extract_strided_slice %205 {offsets = [0, 0], sizes = [8, 32], strides = [1, 1]} : vector<8x128xf32> to vector<8x32xf32>
    %207 = vector.extract_strided_slice %205 {offsets = [0, 32], sizes = [8, 32], strides = [1, 1]} : vector<8x128xf32> to vector<8x32xf32>
    %208 = vector.extract_strided_slice %205 {offsets = [0, 64], sizes = [8, 32], strides = [1, 1]} : vector<8x128xf32> to vector<8x32xf32>
    %cst_47 = arith.constant 2.000000e+00 : f32
    %209 = vector.broadcast %cst_47 : f32 to vector<8x32xf32>
    %210 = arith.mulf %209, %208 : vector<8x32xf32>
    %cst_48 = arith.constant 1.000000e+00 : f32
    %211 = vector.broadcast %cst_48 : f32 to vector<8x32xf32>
    %212 = arith.subf %210, %211 : vector<8x32xf32>
    %213 = vector.extract_strided_slice %205 {offsets = [0, 96], sizes = [8, 32], strides = [1, 1]} : vector<8x128xf32> to vector<8x32xf32>
    %214 = arith.mulf %207, %166 : vector<8x32xf32>
    %215 = arith.mulf %206, %212 : vector<8x32xf32>
    %216 = arith.addf %214, %215 : vector<8x32xf32>
    %217 = math.tanh %216 : vector<8x32xf32>
    %218 = arith.mulf %213, %217 : vector<8x32xf32>
    %c3_i32 = arith.constant 3 : i32
    %219 = vector.broadcast %c3_i32 : i32 to vector<8x1xi32>
    %220 = arith.cmpi eq, %2, %219 : vector<8x1xi32>
    %221 = vector.shape_cast %220 : vector<8x1xi1> to vector<8x1xi1>
    %222 = vector.broadcast %221 : vector<8x1xi1> to vector<8x32xi1>
    %223 = arith.select %222, %218, %173 : vector<8x32xi1>, vector<8x32xf32>
    %224 = vector.extract_strided_slice %18 {offsets = [32, 0], sizes = [8, 128], strides = [1, 1]} : vector<64x128xf32> to vector<8x128xf32>
    %225 = arith.truncf %195 : vector<8x32xf32> to vector<8x32xbf16>
    %cst_49 = arith.constant dense<0.000000e+00> : vector<8x128xf32>
    %226 = tpu.matmul %225, %7, %cst_49 {dimension_numbers = #tpu.dot_dimension_numbers<[1], [0], [0], [1], [0, 0, 1, 1], [], []>} : vector<8x32xbf16>, vector<32x128xbf16>, vector<8x128xf32> -> vector<8x128xf32>
    %227 = arith.addf %224, %226 : vector<8x128xf32>
    %228 = arith.negf %227 : vector<8x128xf32>
    %229 = math.exp %228 : vector<8x128xf32>
    %cst_50 = arith.constant 1.000000e+00 : f32
    %230 = vector.broadcast %cst_50 : f32 to vector<8x128xf32>
    %231 = arith.addf %230, %229 : vector<8x128xf32>
    %232 = arith.divf %230, %231 : vector<8x128xf32>
    %233 = vector.extract_strided_slice %232 {offsets = [0, 0], sizes = [8, 32], strides = [1, 1]} : vector<8x128xf32> to vector<8x32xf32>
    %234 = vector.extract_strided_slice %232 {offsets = [0, 32], sizes = [8, 32], strides = [1, 1]} : vector<8x128xf32> to vector<8x32xf32>
    %235 = vector.extract_strided_slice %232 {offsets = [0, 64], sizes = [8, 32], strides = [1, 1]} : vector<8x128xf32> to vector<8x32xf32>
    %cst_51 = arith.constant 2.000000e+00 : f32
    %236 = vector.broadcast %cst_51 : f32 to vector<8x32xf32>
    %237 = arith.mulf %236, %235 : vector<8x32xf32>
    %cst_52 = arith.constant 1.000000e+00 : f32
    %238 = vector.broadcast %cst_52 : f32 to vector<8x32xf32>
    %239 = arith.subf %237, %238 : vector<8x32xf32>
    %240 = vector.extract_strided_slice %232 {offsets = [0, 96], sizes = [8, 32], strides = [1, 1]} : vector<8x128xf32> to vector<8x32xf32>
    %241 = arith.mulf %234, %193 : vector<8x32xf32>
    %242 = arith.mulf %233, %239 : vector<8x32xf32>
    %243 = arith.addf %241, %242 : vector<8x32xf32>
    %244 = math.tanh %243 : vector<8x32xf32>
    %245 = arith.mulf %240, %244 : vector<8x32xf32>
    %246 = tpu.concatenate %245, %218 in 1 : vector<8x32xf32>, vector<8x32xf32> -> vector<8x64xf32>
    %247 = arith.truncf %246 : vector<8x64xf32> to vector<8x64xbf16>
    %cst_53 = arith.constant dense<0.000000e+00> : vector<8x128xf32>
    %248 = tpu.matmul %247, %10, %cst_53 {dimension_numbers = #tpu.dot_dimension_numbers<[1], [0], [0], [1], [0, 0, 1, 1], [], []>} : vector<8x64xbf16>, vector<64x128xbf16>, vector<8x128xf32> -> vector<8x128xf32>
    %249 = vector.broadcast %11 : vector<1x128xf32> to vector<8x128xf32>
    %250 = arith.addf %248, %249 : vector<8x128xf32>
    %251 = arith.negf %250 : vector<8x128xf32>
    %252 = math.exp %251 : vector<8x128xf32>
    %cst_54 = arith.constant 1.000000e+00 : f32
    %253 = vector.broadcast %cst_54 : f32 to vector<8x128xf32>
    %254 = arith.addf %253, %252 : vector<8x128xf32>
    %255 = arith.divf %253, %254 : vector<8x128xf32>
    %256 = vector.extract_strided_slice %255 {offsets = [0, 0], sizes = [8, 32], strides = [1, 1]} : vector<8x128xf32> to vector<8x32xf32>
    %257 = vector.extract_strided_slice %255 {offsets = [0, 32], sizes = [8, 32], strides = [1, 1]} : vector<8x128xf32> to vector<8x32xf32>
    %258 = vector.extract_strided_slice %255 {offsets = [0, 64], sizes = [8, 32], strides = [1, 1]} : vector<8x128xf32> to vector<8x32xf32>
    %cst_55 = arith.constant 2.000000e+00 : f32
    %259 = vector.broadcast %cst_55 : f32 to vector<8x32xf32>
    %260 = arith.mulf %259, %258 : vector<8x32xf32>
    %cst_56 = arith.constant 1.000000e+00 : f32
    %261 = vector.broadcast %cst_56 : f32 to vector<8x32xf32>
    %262 = arith.subf %260, %261 : vector<8x32xf32>
    %263 = vector.extract_strided_slice %255 {offsets = [0, 96], sizes = [8, 32], strides = [1, 1]} : vector<8x128xf32> to vector<8x32xf32>
    %264 = arith.mulf %257, %216 : vector<8x32xf32>
    %265 = arith.mulf %256, %262 : vector<8x32xf32>
    %266 = arith.addf %264, %265 : vector<8x32xf32>
    %267 = math.tanh %266 : vector<8x32xf32>
    %268 = arith.mulf %263, %267 : vector<8x32xf32>
    %c4_i32 = arith.constant 4 : i32
    %269 = vector.broadcast %c4_i32 : i32 to vector<8x1xi32>
    %270 = arith.cmpi eq, %2, %269 : vector<8x1xi32>
    %271 = vector.shape_cast %270 : vector<8x1xi1> to vector<8x1xi1>
    %272 = vector.broadcast %271 : vector<8x1xi1> to vector<8x32xi1>
    %273 = arith.select %272, %268, %223 : vector<8x32xi1>, vector<8x32xf32>
    %274 = vector.extract_strided_slice %18 {offsets = [40, 0], sizes = [8, 128], strides = [1, 1]} : vector<64x128xf32> to vector<8x128xf32>
    %275 = arith.truncf %245 : vector<8x32xf32> to vector<8x32xbf16>
    %cst_57 = arith.constant dense<0.000000e+00> : vector<8x128xf32>
    %276 = tpu.matmul %275, %7, %cst_57 {dimension_numbers = #tpu.dot_dimension_numbers<[1], [0], [0], [1], [0, 0, 1, 1], [], []>} : vector<8x32xbf16>, vector<32x128xbf16>, vector<8x128xf32> -> vector<8x128xf32>
    %277 = arith.addf %274, %276 : vector<8x128xf32>
    %278 = arith.negf %277 : vector<8x128xf32>
    %279 = math.exp %278 : vector<8x128xf32>
    %cst_58 = arith.constant 1.000000e+00 : f32
    %280 = vector.broadcast %cst_58 : f32 to vector<8x128xf32>
    %281 = arith.addf %280, %279 : vector<8x128xf32>
    %282 = arith.divf %280, %281 : vector<8x128xf32>
    %283 = vector.extract_strided_slice %282 {offsets = [0, 0], sizes = [8, 32], strides = [1, 1]} : vector<8x128xf32> to vector<8x32xf32>
    %284 = vector.extract_strided_slice %282 {offsets = [0, 32], sizes = [8, 32], strides = [1, 1]} : vector<8x128xf32> to vector<8x32xf32>
    %285 = vector.extract_strided_slice %282 {offsets = [0, 64], sizes = [8, 32], strides = [1, 1]} : vector<8x128xf32> to vector<8x32xf32>
    %cst_59 = arith.constant 2.000000e+00 : f32
    %286 = vector.broadcast %cst_59 : f32 to vector<8x32xf32>
    %287 = arith.mulf %286, %285 : vector<8x32xf32>
    %cst_60 = arith.constant 1.000000e+00 : f32
    %288 = vector.broadcast %cst_60 : f32 to vector<8x32xf32>
    %289 = arith.subf %287, %288 : vector<8x32xf32>
    %290 = vector.extract_strided_slice %282 {offsets = [0, 96], sizes = [8, 32], strides = [1, 1]} : vector<8x128xf32> to vector<8x32xf32>
    %291 = arith.mulf %284, %243 : vector<8x32xf32>
    %292 = arith.mulf %283, %289 : vector<8x32xf32>
    %293 = arith.addf %291, %292 : vector<8x32xf32>
    %294 = math.tanh %293 : vector<8x32xf32>
    %295 = arith.mulf %290, %294 : vector<8x32xf32>
    %296 = tpu.concatenate %295, %268 in 1 : vector<8x32xf32>, vector<8x32xf32> -> vector<8x64xf32>
    %297 = arith.truncf %296 : vector<8x64xf32> to vector<8x64xbf16>
    %cst_61 = arith.constant dense<0.000000e+00> : vector<8x128xf32>
    %298 = tpu.matmul %297, %10, %cst_61 {dimension_numbers = #tpu.dot_dimension_numbers<[1], [0], [0], [1], [0, 0, 1, 1], [], []>} : vector<8x64xbf16>, vector<64x128xbf16>, vector<8x128xf32> -> vector<8x128xf32>
    %299 = vector.broadcast %11 : vector<1x128xf32> to vector<8x128xf32>
    %300 = arith.addf %298, %299 : vector<8x128xf32>
    %301 = arith.negf %300 : vector<8x128xf32>
    %302 = math.exp %301 : vector<8x128xf32>
    %cst_62 = arith.constant 1.000000e+00 : f32
    %303 = vector.broadcast %cst_62 : f32 to vector<8x128xf32>
    %304 = arith.addf %303, %302 : vector<8x128xf32>
    %305 = arith.divf %303, %304 : vector<8x128xf32>
    %306 = vector.extract_strided_slice %305 {offsets = [0, 0], sizes = [8, 32], strides = [1, 1]} : vector<8x128xf32> to vector<8x32xf32>
    %307 = vector.extract_strided_slice %305 {offsets = [0, 32], sizes = [8, 32], strides = [1, 1]} : vector<8x128xf32> to vector<8x32xf32>
    %308 = vector.extract_strided_slice %305 {offsets = [0, 64], sizes = [8, 32], strides = [1, 1]} : vector<8x128xf32> to vector<8x32xf32>
    %cst_63 = arith.constant 2.000000e+00 : f32
    %309 = vector.broadcast %cst_63 : f32 to vector<8x32xf32>
    %310 = arith.mulf %309, %308 : vector<8x32xf32>
    %cst_64 = arith.constant 1.000000e+00 : f32
    %311 = vector.broadcast %cst_64 : f32 to vector<8x32xf32>
    %312 = arith.subf %310, %311 : vector<8x32xf32>
    %313 = vector.extract_strided_slice %305 {offsets = [0, 96], sizes = [8, 32], strides = [1, 1]} : vector<8x128xf32> to vector<8x32xf32>
    %314 = arith.mulf %307, %266 : vector<8x32xf32>
    %315 = arith.mulf %306, %312 : vector<8x32xf32>
    %316 = arith.addf %314, %315 : vector<8x32xf32>
    %317 = math.tanh %316 : vector<8x32xf32>
    %318 = arith.mulf %313, %317 : vector<8x32xf32>
    %c5_i32 = arith.constant 5 : i32
    %319 = vector.broadcast %c5_i32 : i32 to vector<8x1xi32>
    %320 = arith.cmpi eq, %2, %319 : vector<8x1xi32>
    %321 = vector.shape_cast %320 : vector<8x1xi1> to vector<8x1xi1>
    %322 = vector.broadcast %321 : vector<8x1xi1> to vector<8x32xi1>
    %323 = arith.select %322, %318, %273 : vector<8x32xi1>, vector<8x32xf32>
    %324 = vector.extract_strided_slice %18 {offsets = [48, 0], sizes = [8, 128], strides = [1, 1]} : vector<64x128xf32> to vector<8x128xf32>
    %325 = arith.truncf %295 : vector<8x32xf32> to vector<8x32xbf16>
    %cst_65 = arith.constant dense<0.000000e+00> : vector<8x128xf32>
    %326 = tpu.matmul %325, %7, %cst_65 {dimension_numbers = #tpu.dot_dimension_numbers<[1], [0], [0], [1], [0, 0, 1, 1], [], []>} : vector<8x32xbf16>, vector<32x128xbf16>, vector<8x128xf32> -> vector<8x128xf32>
    %327 = arith.addf %324, %326 : vector<8x128xf32>
    %328 = arith.negf %327 : vector<8x128xf32>
    %329 = math.exp %328 : vector<8x128xf32>
    %cst_66 = arith.constant 1.000000e+00 : f32
    %330 = vector.broadcast %cst_66 : f32 to vector<8x128xf32>
    %331 = arith.addf %330, %329 : vector<8x128xf32>
    %332 = arith.divf %330, %331 : vector<8x128xf32>
    %333 = vector.extract_strided_slice %332 {offsets = [0, 0], sizes = [8, 32], strides = [1, 1]} : vector<8x128xf32> to vector<8x32xf32>
    %334 = vector.extract_strided_slice %332 {offsets = [0, 32], sizes = [8, 32], strides = [1, 1]} : vector<8x128xf32> to vector<8x32xf32>
    %335 = vector.extract_strided_slice %332 {offsets = [0, 64], sizes = [8, 32], strides = [1, 1]} : vector<8x128xf32> to vector<8x32xf32>
    %cst_67 = arith.constant 2.000000e+00 : f32
    %336 = vector.broadcast %cst_67 : f32 to vector<8x32xf32>
    %337 = arith.mulf %336, %335 : vector<8x32xf32>
    %cst_68 = arith.constant 1.000000e+00 : f32
    %338 = vector.broadcast %cst_68 : f32 to vector<8x32xf32>
    %339 = arith.subf %337, %338 : vector<8x32xf32>
    %340 = vector.extract_strided_slice %332 {offsets = [0, 96], sizes = [8, 32], strides = [1, 1]} : vector<8x128xf32> to vector<8x32xf32>
    %341 = arith.mulf %334, %293 : vector<8x32xf32>
    %342 = arith.mulf %333, %339 : vector<8x32xf32>
    %343 = arith.addf %341, %342 : vector<8x32xf32>
    %344 = math.tanh %343 : vector<8x32xf32>
    %345 = arith.mulf %340, %344 : vector<8x32xf32>
    %346 = tpu.concatenate %345, %318 in 1 : vector<8x32xf32>, vector<8x32xf32> -> vector<8x64xf32>
    %347 = arith.truncf %346 : vector<8x64xf32> to vector<8x64xbf16>
    %cst_69 = arith.constant dense<0.000000e+00> : vector<8x128xf32>
    %348 = tpu.matmul %347, %10, %cst_69 {dimension_numbers = #tpu.dot_dimension_numbers<[1], [0], [0], [1], [0, 0, 1, 1], [], []>} : vector<8x64xbf16>, vector<64x128xbf16>, vector<8x128xf32> -> vector<8x128xf32>
    %349 = vector.broadcast %11 : vector<1x128xf32> to vector<8x128xf32>
    %350 = arith.addf %348, %349 : vector<8x128xf32>
    %351 = arith.negf %350 : vector<8x128xf32>
    %352 = math.exp %351 : vector<8x128xf32>
    %cst_70 = arith.constant 1.000000e+00 : f32
    %353 = vector.broadcast %cst_70 : f32 to vector<8x128xf32>
    %354 = arith.addf %353, %352 : vector<8x128xf32>
    %355 = arith.divf %353, %354 : vector<8x128xf32>
    %356 = vector.extract_strided_slice %355 {offsets = [0, 0], sizes = [8, 32], strides = [1, 1]} : vector<8x128xf32> to vector<8x32xf32>
    %357 = vector.extract_strided_slice %355 {offsets = [0, 32], sizes = [8, 32], strides = [1, 1]} : vector<8x128xf32> to vector<8x32xf32>
    %358 = vector.extract_strided_slice %355 {offsets = [0, 64], sizes = [8, 32], strides = [1, 1]} : vector<8x128xf32> to vector<8x32xf32>
    %cst_71 = arith.constant 2.000000e+00 : f32
    %359 = vector.broadcast %cst_71 : f32 to vector<8x32xf32>
    %360 = arith.mulf %359, %358 : vector<8x32xf32>
    %cst_72 = arith.constant 1.000000e+00 : f32
    %361 = vector.broadcast %cst_72 : f32 to vector<8x32xf32>
    %362 = arith.subf %360, %361 : vector<8x32xf32>
    %363 = vector.extract_strided_slice %355 {offsets = [0, 96], sizes = [8, 32], strides = [1, 1]} : vector<8x128xf32> to vector<8x32xf32>
    %364 = arith.mulf %357, %316 : vector<8x32xf32>
    %365 = arith.mulf %356, %362 : vector<8x32xf32>
    %366 = arith.addf %364, %365 : vector<8x32xf32>
    %367 = math.tanh %366 : vector<8x32xf32>
    %368 = arith.mulf %363, %367 : vector<8x32xf32>
    %c6_i32 = arith.constant 6 : i32
    %369 = vector.broadcast %c6_i32 : i32 to vector<8x1xi32>
    %370 = arith.cmpi eq, %2, %369 : vector<8x1xi32>
    %371 = vector.shape_cast %370 : vector<8x1xi1> to vector<8x1xi1>
    %372 = vector.broadcast %371 : vector<8x1xi1> to vector<8x32xi1>
    %373 = arith.select %372, %368, %323 : vector<8x32xi1>, vector<8x32xf32>
    %374 = vector.extract_strided_slice %18 {offsets = [56, 0], sizes = [8, 128], strides = [1, 1]} : vector<64x128xf32> to vector<8x128xf32>
    %375 = arith.truncf %345 : vector<8x32xf32> to vector<8x32xbf16>
    %cst_73 = arith.constant dense<0.000000e+00> : vector<8x128xf32>
    %376 = tpu.matmul %375, %7, %cst_73 {dimension_numbers = #tpu.dot_dimension_numbers<[1], [0], [0], [1], [0, 0, 1, 1], [], []>} : vector<8x32xbf16>, vector<32x128xbf16>, vector<8x128xf32> -> vector<8x128xf32>
    %377 = arith.addf %374, %376 : vector<8x128xf32>
    %378 = arith.negf %377 : vector<8x128xf32>
    %379 = math.exp %378 : vector<8x128xf32>
    %cst_74 = arith.constant 1.000000e+00 : f32
    %380 = vector.broadcast %cst_74 : f32 to vector<8x128xf32>
    %381 = arith.addf %380, %379 : vector<8x128xf32>
    %382 = arith.divf %380, %381 : vector<8x128xf32>
    %383 = vector.extract_strided_slice %382 {offsets = [0, 0], sizes = [8, 32], strides = [1, 1]} : vector<8x128xf32> to vector<8x32xf32>
    %384 = vector.extract_strided_slice %382 {offsets = [0, 32], sizes = [8, 32], strides = [1, 1]} : vector<8x128xf32> to vector<8x32xf32>
    %385 = vector.extract_strided_slice %382 {offsets = [0, 64], sizes = [8, 32], strides = [1, 1]} : vector<8x128xf32> to vector<8x32xf32>
    %cst_75 = arith.constant 2.000000e+00 : f32
    %386 = vector.broadcast %cst_75 : f32 to vector<8x32xf32>
    %387 = arith.mulf %386, %385 : vector<8x32xf32>
    %cst_76 = arith.constant 1.000000e+00 : f32
    %388 = vector.broadcast %cst_76 : f32 to vector<8x32xf32>
    %389 = arith.subf %387, %388 : vector<8x32xf32>
    %390 = vector.extract_strided_slice %382 {offsets = [0, 96], sizes = [8, 32], strides = [1, 1]} : vector<8x128xf32> to vector<8x32xf32>
    %391 = arith.mulf %384, %343 : vector<8x32xf32>
    %392 = arith.mulf %383, %389 : vector<8x32xf32>
    %393 = arith.addf %391, %392 : vector<8x32xf32>
    %394 = math.tanh %393 : vector<8x32xf32>
    %395 = arith.mulf %390, %394 : vector<8x32xf32>
    %396 = tpu.concatenate %395, %368 in 1 : vector<8x32xf32>, vector<8x32xf32> -> vector<8x64xf32>
    %397 = arith.truncf %396 : vector<8x64xf32> to vector<8x64xbf16>
    %cst_77 = arith.constant dense<0.000000e+00> : vector<8x128xf32>
    %398 = tpu.matmul %397, %10, %cst_77 {dimension_numbers = #tpu.dot_dimension_numbers<[1], [0], [0], [1], [0, 0, 1, 1], [], []>} : vector<8x64xbf16>, vector<64x128xbf16>, vector<8x128xf32> -> vector<8x128xf32>
    %399 = vector.broadcast %11 : vector<1x128xf32> to vector<8x128xf32>
    %400 = arith.addf %398, %399 : vector<8x128xf32>
    %401 = arith.negf %400 : vector<8x128xf32>
    %402 = math.exp %401 : vector<8x128xf32>
    %cst_78 = arith.constant 1.000000e+00 : f32
    %403 = vector.broadcast %cst_78 : f32 to vector<8x128xf32>
    %404 = arith.addf %403, %402 : vector<8x128xf32>
    %405 = arith.divf %403, %404 : vector<8x128xf32>
    %406 = vector.extract_strided_slice %405 {offsets = [0, 0], sizes = [8, 32], strides = [1, 1]} : vector<8x128xf32> to vector<8x32xf32>
    %407 = vector.extract_strided_slice %405 {offsets = [0, 32], sizes = [8, 32], strides = [1, 1]} : vector<8x128xf32> to vector<8x32xf32>
    %408 = vector.extract_strided_slice %405 {offsets = [0, 64], sizes = [8, 32], strides = [1, 1]} : vector<8x128xf32> to vector<8x32xf32>
    %cst_79 = arith.constant 2.000000e+00 : f32
    %409 = vector.broadcast %cst_79 : f32 to vector<8x32xf32>
    %410 = arith.mulf %409, %408 : vector<8x32xf32>
    %cst_80 = arith.constant 1.000000e+00 : f32
    %411 = vector.broadcast %cst_80 : f32 to vector<8x32xf32>
    %412 = arith.subf %410, %411 : vector<8x32xf32>
    %413 = vector.extract_strided_slice %405 {offsets = [0, 96], sizes = [8, 32], strides = [1, 1]} : vector<8x128xf32> to vector<8x32xf32>
    %414 = arith.mulf %407, %366 : vector<8x32xf32>
    %415 = arith.mulf %406, %412 : vector<8x32xf32>
    %416 = arith.addf %414, %415 : vector<8x32xf32>
    %417 = math.tanh %416 : vector<8x32xf32>
    %418 = arith.mulf %413, %417 : vector<8x32xf32>
    %c7_i32 = arith.constant 7 : i32
    %419 = vector.broadcast %c7_i32 : i32 to vector<8x1xi32>
    %420 = arith.cmpi eq, %2, %419 : vector<8x1xi32>
    %421 = vector.shape_cast %420 : vector<8x1xi1> to vector<8x1xi1>
    %422 = vector.broadcast %421 : vector<8x1xi1> to vector<8x32xi1>
    %423 = arith.select %422, %418, %373 : vector<8x32xi1>, vector<8x32xf32>
    %424 = arith.truncf %423 : vector<8x32xf32> to vector<8x32xbf16>
    %cst_81 = arith.constant dense<0.000000e+00> : vector<8x128xf32>
    %425 = tpu.matmul %424, %13, %cst_81 {dimension_numbers = #tpu.dot_dimension_numbers<[1], [0], [0], [1], [0, 0, 1, 1], [], []>} : vector<8x32xbf16>, vector<32x128xbf16>, vector<8x128xf32> -> vector<8x128xf32>
    %426 = vector.broadcast %14 : vector<1x128xf32> to vector<8x128xf32>
    %427 = arith.addf %425, %426 : vector<8x128xf32>
    %428 = vector.extract_strided_slice %427 {offsets = [0, 0], sizes = [8, 8], strides = [1, 1]} : vector<8x128xf32> to vector<8x8xf32>
    %c0_82 = arith.constant 0 : index
    %c0_83 = arith.constant 0 : index
    %429 = vector.load %arg4[%c0_82, %c0_83] : memref<8x8xf32, #tpu.memory_space<vmem>>, vector<8x8xf32>
    tpu.vector_store %arg4[%c0_82, %c0_83], %428 {strides = array<i32>} : memref<8x8xf32, #tpu.memory_space<vmem>>, vector<8x8xf32>,
    return
  }
  func.func @transform_0(%arg0: i32) -> (i32, i32) {
    %c0_i32 = arith.constant 0 : i32
    %c0_i32_0 = arith.constant 0 : i32
    %c0_i32_1 = arith.constant 0 : i32
    return %c0_i32, %c0_i32_0 : i32, i32
  }
  func.func @transform_1(%arg0: i32) -> (i32, i32) {
    %c0_i32 = arith.constant 0 : i32
    %c0_i32_0 = arith.constant 0 : i32
    %c0_i32_1 = arith.constant 0 : i32
    return %c0_i32, %c0_i32_0 : i32, i32
  }
  func.func @transform_2(%arg0: i32) -> (i32, i32) {
    %c0_i32 = arith.constant 0 : i32
    %c0_i32_0 = arith.constant 0 : i32
    %c0_i32_1 = arith.constant 0 : i32
    return %c0_i32, %c0_i32_0 : i32, i32
  }
  func.func @transform_3(%arg0: i32) -> (i32, i32) {
    %c0_i32 = arith.constant 0 : i32
    %c0_i32_0 = arith.constant 0 : i32
    %c0_i32_1 = arith.constant 0 : i32
    return %c0_i32, %c0_i32_0 : i32, i32
  }
}

</mosaic_0001>

<bundles_post_ra>
// kernel: forward.1
= control target key start
LH: loop header
LB: loop body
LE: loop exit
PB: predicated region body
PF: predicated region fallthrough
CT: control target
= control target key end

     0   :  { %8 = vsyncpa [#allocation3], 0  ;;  %s2412_s0 = inlined_call_operand.vmem [shape: f32[64,16], index: 0, kind: input, shape index: {}]   ;;  %s2413_s1 = inlined_call_operand.vmem [shape: s32[8,1], index: 1, kind: input, shape index: {}]   ;;  %s2414_s2 = inlined_call_operand.hbm [shape: f32[168,128], index: 2, kind: input, shape index: {}]   ;;  %s2415_s3 = inlined_call_operand.hbm [shape: f32[8,8], index: 3, kind: output, shape index: {}]  }
   0x1   :  { %9 = vsyncpa [#allocation4], 0  ;;  %s1948_s12 = smov [#allocation2]   ;;  %s1900_s16 = scalar_lea.hbm %s2414_s2, 2688 }
   0x2   :  { %s19_s13 = sshll.u32 %s1948_s12, 4  ;;  %p1901_p0 = scmp.ne.s32.totalorder %s2414_s2, %s1900_s16  ;;  %s20_s13 = int_to_ptr.vmem [resolvable:$true] %s19_s13 }
   0x3   :  { %p1904_p1 = scmp.lt.u32.totalorder %s1900_s16, %s2414_s2 }
   0x5   :  { %p1906_p2 = pnand %p1904_p1, %p1901_p0 }
   0x7   :  { %1909 = shalt.err (!%p1906_p2)
}
   0x8   :  { %s1910_s21 = scalar_lea.vmem %s20_s13, 2688  ;;  %p1915_p4 = scmp.lt.s32.totalorder %s20_s13, %s20_s13 }
   0x9   :  { %p1911_p3 = scmp.ne.s32.totalorder %s20_s13, %s1910_s21  ;;  %p1916_p5 = scmp.lt.s32.totalorder %s1910_s21, %s1910_s21 }
   0xb   :  { %p1917_p6 = por %p1916_p5, %p1915_p4 }
   0xd   :  { %p1918_p7 = pnand %p1917_p6, %p1911_p3 }
   0xf   :  { %1921 = shalt.err (!%p1918_p7)
}
  0x10   :  { %s1949_s22 = smov 128   ;;  %s1950_s23 = smov 8  }
  0x11   :  { %25 = dma.hbm_to_vmem [thread:$0]  %s2414_s2, 2688, %s20_s13, [#allocation3], %s1949_s22, %s1949_s22, %s1950_s23  }
  0x12   :  { %1944 = dma.done.wait [#allocation3], 2688  }
  0x13   :  { %1945 = vsyncadd [#allocation3], 4294964608  ;;  %v1951_v0 = vmov 0.0   ;;  %vm1952_vm0 = vmmov 0   ;;  %v1953_v1 = vmov 0   ;;  %v40_v2 = vld [vmem:[#allocation2] sm:$0xff] }
  0x14   :  { %1624 = vmatprep.subr.bf16.mxu1 %v1951_v0  ;;  %1628 = vmatprep.mubr.msk.bf16.mxu1 %vm1952_vm0, %v1951_v0  ;;  %v41_v3 = vld [vmem:[#allocation2 + $0x8] sm:$0xff]  ;;  %v43_v4 = vld [vmem:[#allocation2 + $0x10] sm:$0xff]  ;;  %v44_v6 = vld [vmem:[#allocation2 + $0x18] sm:$0xff]  ;;  %vm78_vm1 = vcmask 130048   ;;  %s1954_s6 = smov 64   ;;  %s1955_s7 = smov 32  }
  0x15   :  { %1801 = vset.pattern.permute.xlu1 %v1953_v1  ;;  %1802 = vset.pattern.permute.xlu0 %v1953_v1  ;;  %v42_v5 = vpack.c.bf16 %v41_v3, %v40_v2  ;;  %v32_v7 = vld [vmem:[%s2412_s0] sm:$0xff]  ;;  %v33_v8 = vld [vmem:[%s2412_s0 + $0x8] sm:$0xff]  ;;  %v2000_v9 = vpack.c.bf16 %v44_v6, %v43_v4  ;;  %v34_v11 = vld [vmem:[%s2412_s0 + $0x10] sm:$0xff]  ;;  %vm156_vm2 = vcmask 261120   ;;  %vm236_vm3 = vcmask 523264  }
  0x16   :  { %v70_v10 = vpack.c.bf16 %v33_v8, %v32_v7  ;;  %v35_v12 = vld [vmem:[%s2412_s0 + $0x18] sm:$0xff]  ;;  %v45_v13 = vld [vmem:[#allocation2 + $0x20] sm:$0xff]  ;;  %v46_v15 = vld [vmem:[#allocation2 + $0x28] sm:$0xff] }
  0x17   :  { %1614 = vmatprep.subr.bf16.mxu0 %v42_v5  ;;  %v71_v14 = vpack.c.bf16 %v35_v12, %v34_v11  ;;  %1625 = vmatpush3.bf16.msra.mxu1 %v2000_v9  ;;  %v2009_v16 = vpack.c.bf16 %v46_v15, %v45_v13  ;;  %v2024_v17 = vld [vmem:[#allocation2 + $0x30] ss:$0 sm:$0xff]  ;;  %v50_v39 = vld [vmem:[#allocation2 + $0x38] sm:$0xff]  ;;  %v51_v40 = vld [vmem:[#allocation2 + $0x40] sm:$0xff] }
  0x18   :  { %1615 = vmatpush3.bf16.msra.mxu0 %v42_v5  ;;  %1616 = vmatprep.mubr.msk.bf16.mxu0 %vm78_vm1, %v70_v10  ;;  %v52_v41 = vld [vmem:[#allocation2 + $0x48] sm:$0xff]  ;;  %v2038_v42 = vpack.c.bf16 %v51_v40, %v50_v39  ;;  %v53_v43 = vld [vmem:[#allocation2 + $0x50] sm:$0xff]  ;;  %v36_v44 = vld [vmem:[%s2412_s0 + $0x20] sm:$0xff] }
  0x19   :  { %1626 = vmatprep.subr.bf16.mxu1 %v1951_v0  ;;  %1632 = vmatprep.subr.bf16.mxu0 %v1951_v0  ;;  %v37_v45 = vld [vmem:[%s2412_s0 + $0x28] sm:$0xff]  ;;  %v38_v47 = vld [vmem:[%s2412_s0 + $0x30] sm:$0xff]  ;;  %v39_v48 = vld [vmem:[%s2412_s0 + $0x38] sm:$0xff]  ;;  %v2053_v49 = vpack.c.bf16 %v53_v43, %v52_v41 }
  0x1a   :  { %v72_v46 = vpack.c.bf16 %v37_v45, %v36_v44  ;;  %v73_v50 = vpack.c.bf16 %v39_v48, %v38_v47  ;;  %v54_v51 = vld [vmem:[#allocation2 + $0x58] sm:$0xff]  ;;  %v55_v52 = vld [vmem:[#allocation2 + $0x60] sm:$0xff]  ;;  %v56_v55 = vld [vmem:[#allocation2 + $0x68] sm:$0xff] }
  0x1b   :  { %1617 = vmatmul.mubr.msk.bf16.vlgmr.msra.gmra.mrb[0].mxu0 %vm78_vm1, %v71_v14  ;;  %1627 = vmatpush3.bf16.msra.mxu1 %v2009_v16  ;;  %v2061_v53 = vpack.c.bf16 %v55_v52, %v54_v51  ;;  %v57_v56 = vld [vmem:[#allocation2 + $0x70] sm:$0xff]  ;;  %v2102_v8 = vld [vmem:[#allocation2 + $0x78] ss:$0 sm:$0xff] }
  0x1c   :  { %1644 = vmatprep.subr.bf16.mxu1 %v1951_v0  ;;  %1633 = vmatpush3.bf16.msra.mxu0 %v2038_v42  ;;  %v2067_v57 = vpack.c.bf16 %v57_v56, %v56_v55 }
  0x1d   :  { %1634 = vmatprep.subr.bf16.mxu0 %v1951_v0  ;;  %1620 = vmatprep.mubr.msk.bf16.mxu0 %vm78_vm1, %v72_v46 }
  0x1e   :  { %1629 = vmatmul.mubr.bf16.vlgmr.msra.gmra.mrb[0].mxu1 %v1953_v1 }
  0x1f   :  { %1645 = vmatpush3.bf16.msra.mxu1 %v2000_v9  ;;  %1648 = vmatprep.mubr.msk.bf16.mxu1 %vm1952_vm0, %v1951_v0 }
  0x20   :  { %1646 = vmatprep.subr.bf16.mxu1 %v1951_v0  ;;  %1635 = vmatpush3.bf16.msra.mxu0 %v2053_v49 }
  0x21   :  { %1636 = vmatprep.subr.bf16.mxu0 %v1951_v0 }
  0x23   :  { %1647 = vmatpush3.bf16.msra.mxu1 %v2009_v16  ;;  %1621 = vmatmul.mubr.msk.bf16.gmra.mrb[4].mxu0 %vm78_vm1, %v73_v50 }
  0x24   :  { %1652 = vmatprep.subr.bf16.mxu1 %v1951_v0  ;;  %1640 = vmatprep.mubr.msk.bf16.mxu0 %vm1952_vm0, %v1951_v0 }
  0x25   :  { %1637 = vmatpush3.bf16.msra.mxu0 %v2061_v53 }
  0x26   :  { %1638 = vmatprep.subr.bf16.mxu0 %v1951_v0 }
  0x29   :  { %1639 = vmatpush3.bf16.msra.mxu0 %v2067_v57 }
  0x2a   :  { %1664 = vmatprep.subr.bf16.mxu0 %v1951_v0 }
  0xee   :  { %v2026_v18 = vpop.f32.mrb[0].mxu0 }
  0xef   :  { %v125_v19 = vpop.f32.mrb[1].mxu0 }
  0xf0   :  { %v126_v20 = vadd.f32 %v2024_v17, %v125_v19  ;;  %v2029_v21 = vpop.f32.mrb[2].mxu0 }
  0xf1   :  { %v2031_v22 = vpop.f32.mrb[3].mxu0  ;;  %v194_v23 = vpop.f32.mrb[0].mxu1 }
  0xf2   :  { %v200_v24 = vadd.f32 %v194_v23, %v126_v20  ;;  %v1630_v25 = vpop.f32.mrb[1].mxu1  ;;  %v129_v7 = vadd.f32 %v2024_v17, %v2031_v22 }
  0xf3   :  { %v197_v26 = vpop.f32.mrb[2].mxu1 }
  0xf4   :  { %v1492_v27 = vmul.f32 -1.442695, %v200_v24  ;;  %v1631_v28 = vpop.f32.mrb[3].mxu1 }
  0xf6   :  { %1803 = vpow2.f32 %v1492_v27  ;;  %v2073_v61 = vpop.f32.mrb[4].mxu0 }
  0xf7   :  { %v2075_v62 = vpop.f32.mrb[5].mxu0 }
  0xf8   :  { %v2077_v63 = vpop.f32.mrb[6].mxu0 }
  0xf9   :  { %v2079_v2 = vpop.f32.mrb[7].mxu0 }
 0x100   :  { %v1804_v29 = vpop.eup %1803 }
 0x101   :  { %v204_v30 = vadd.f32 1.0, %v1804_v29 }
 0x103   :  { %1805 = vrcp.f32 %v204_v30 }
 0x10d   :  { %v1806_v31 = vpop.eup %1805 }
 0x10e   :  { %v207_v32 = vmul.f32 2.0, %v1806_v31  ;;  %v209_v36 = vmul.f32 0.0, %v1806_v31 }
 0x110   :  { %v1493_v33 = vadd.f32 -1.0, %v207_v32 }
 0x112   :  { %211 = vrot.lane.b32.xlu0 %v1493_v33, %s1954_s6 }
 0x184   :  { %v212_v34 = vpop.permute.xlu0 %211 }
 0x185   :  { %v214_v35 = vmul.f32 %v1806_v31, %v212_v34 }
 0x187   :  { %216 = vrot.lane.b32.xlu0 %v214_v35, %s1955_s7 }
 0x1f9   :  { %v217_v37 = vpop.permute.xlu0 %216 }
 0x1fa   :  { %v2035_v38 = vadd.f32 %v217_v37, %v209_v36 }
 0x1fc   :  { %1807 = vtanh.f32 %v2035_v38 }
 0x206   :  { %v1808_v54 = vpop.eup %1807 }
 0x207   :  { %222 = vrot.lane.b32.xlu1 %v1808_v54, %s1954_s6 }
 0x279   :  { %v223_v58 = vpop.permute.xlu1 %222 }
 0x27a   :  { %v225_v59 = vmul.f32 %v1806_v31, %v223_v58 }
 0x27c   :  { %v312_v60 = vpack.c.bf16 %v225_v59, %v225_v59  ;;  %227 = vrot.lane.b32.xlu1 %v225_v59, %s1955_s7 }
 0x27e   :  { %314 = vrot.lane.b32.xlu0 %v312_v60, %s1955_s7 }
 0x2ee   :  { %v228_v3 = vpop.permute.xlu1 %227 }
 0x2ef   :  { %v230_v4 = vsel %vm156_vm2, %v228_v3, 0.0 }
 0x2f0   :  { %v231_v5 = vpack.c.bf16 %v230_v4, %v230_v4  ;;  %v315_v6 = vpop.permute.xlu0 %314  ;;  %v134_v4 = vadd.f32 %v2026_v18, %v2024_v17 }
 0x2f1   :  { %1649 = vmatmul.mubr.msk.bf16.vlgmr.msra.gmra.mrb[4].mxu1 %vm156_vm2, %v315_v6 }
 0x2f2   :  { %1641 = vmatmul.mubr.msk.bf16.vlgmr.msra.gmra.mrb[8].mxu0 %vm236_vm3, %v231_v5  ;;  %1653 = vmatpush3.bf16.msra.mxu1 %v2038_v42 }
 0x2f3   :  { %1654 = vmatprep.subr.bf16.mxu1 %v1951_v0  ;;  %1665 = vmatpush3.bf16.msra.mxu0 %v2000_v9 }
 0x2f4   :  { %1666 = vmatprep.subr.bf16.mxu0 %v1951_v0  ;;  %1660 = vmatprep.mubr.msk.bf16.mxu1 %vm1952_vm0, %v1951_v0 }
 0x2f5   :  { %1668 = vmatprep.mubr.msk.bf16.mxu0 %vm1952_vm0, %v1951_v0 }
 0x2f6   :  { %1655 = vmatpush3.bf16.msra.mxu1 %v2053_v49 }
 0x2f7   :  { %1656 = vmatprep.subr.bf16.mxu1 %v1951_v0  ;;  %1667 = vmatpush3.bf16.msra.mxu0 %v2009_v16 }
 0x2f8   :  { %1672 = vmatprep.subr.bf16.mxu0 %v1951_v0 }
 0x2fa   :  { %1657 = vmatpush3.bf16.msra.mxu1 %v2061_v53 }
 0x2fb   :  { %1658 = vmatprep.subr.bf16.mxu1 %v1951_v0 }
 0x2fe   :  { %1659 = vmatpush3.bf16.msra.mxu1 %v2067_v57 }
 0x2ff   :  { %1684 = vmatprep.subr.bf16.mxu1 %v1951_v0 }
 0x3c4   :  { %v353_v10 = vpop.f32.mrb[4].mxu1 }
 0x3c5   :  { %v359_v11 = vadd.f32 %v353_v10, %v129_v7  ;;  %v274_v12 = vpop.f32.mrb[8].mxu0  ;;  %v1650_v13 = vpop.f32.mrb[5].mxu1 }
 0x3c6   :  { %v275_v14 = vadd.f32 %v2102_v8, %v274_v12  ;;  %v1642_v15 = vpop.f32.mrb[9].mxu0  ;;  %v356_v19 = vpop.f32.mrb[6].mxu1 }
 0x3c7   :  { %v1499_v20 = vmul.f32 -1.442695, %v359_v11  ;;  %v277_v23 = vpop.f32.mrb[10].mxu0  ;;  %v1651_v24 = vpop.f32.mrb[7].mxu1 }
 0x3c8   :  { %v1496_v25 = vmul.f32 -1.442695, %v275_v14  ;;  %v1643_v26 = vpop.f32.mrb[11].mxu0 }
 0x3c9   :  { %1809 = vpow2.f32 %v1499_v20 }
 0x3ca   :  { %1811 = vpow2.f32 %v1496_v25 }
 0x3d3   :  { %v1810_v27 = vpop.eup %1809 }
 0x3d4   :  { %v1812_v28 = vpop.eup %1811  ;;  %v363_v22 = vadd.f32 1.0, %v1810_v27 }
 0x3d5   :  { %v283_v29 = vadd.f32 1.0, %v1812_v28 }
 0x3d6   :  { %1813 = vrcp.f32 %v363_v22 }
 0x3d7   :  { %1815 = vrcp.f32 %v283_v29 }
 0x3e0   :  { %v1814_v30 = vpop.eup %1813 }
 0x3e1   :  { %v1816_v31 = vpop.eup %1815  ;;  %v366_v32 = vmul.f32 2.0, %v1814_v30  ;;  %v368_v41 = vmul.f32 %v1814_v30, %v2035_v38 }
 0x3e2   :  { %v286_v33 = vmul.f32 2.0, %v1816_v31  ;;  %v288_v44 = vmul.f32 0.0, %v1816_v31 }
 0x3e3   :  { %v1500_v34 = vadd.f32 -1.0, %v366_v32 }
 0x3e4   :  { %v1497_v35 = vadd.f32 -1.0, %v286_v33 }
 0x3e5   :  { %370 = vrot.lane.b32.xlu0 %v1500_v34, %s1954_s6 }
 0x3e6   :  { %290 = vrot.lane.b32.xlu1 %v1497_v35, %s1954_s6 }
 0x457   :  { %v371_v36 = vpop.permute.xlu0 %370 }
 0x458   :  { %v373_v37 = vmul.f32 %v1814_v30, %v371_v36  ;;  %v291_v39 = vpop.permute.xlu1 %290 }
 0x459   :  { %v293_v40 = vmul.f32 %v1816_v31, %v291_v39 }
 0x45a   :  { %375 = vrot.lane.b32.xlu0 %v373_v37, %s1955_s7 }
 0x45b   :  { %295 = vrot.lane.b32.xlu1 %v293_v40, %s1955_s7 }
 0x4cc   :  { %v376_v43 = vpop.permute.xlu0 %375 }
 0x4cd   :  { %v2110_v45 = vadd.f32 %v376_v43, %v368_v41  ;;  %v296_v46 = vpop.permute.xlu1 %295 }
 0x4ce   :  { %v2112_v47 = vadd.f32 %v296_v46, %v288_v44 }
 0x4cf   :  { %1817 = vtanh.f32 %v2110_v45 }
 0x4d0   :  { %1819 = vtanh.f32 %v2112_v47 }
 0x4d9   :  { %v1818_v48 = vpop.eup %1817 }
 0x4da   :  { %v1820_v50 = vpop.eup %1819  ;;  %381 = vrot.lane.b32.xlu0 %v1818_v48, %s1954_s6 }
 0x4db   :  { %301 = vrot.lane.b32.xlu1 %v1820_v50, %s1954_s6 }
 0x54c   :  { %v382_v51 = vpop.permute.xlu0 %381 }
 0x54d   :  { %v384_v52 = vmul.f32 %v1814_v30, %v382_v51  ;;  %v302_v38 = vpop.permute.xlu1 %301 }
 0x54e   :  { %v2118_v54 = vmul.f32 %v1816_v31, %v302_v38 }
 0x54f   :  { %386 = vrot.lane.b32.xlu1 %v384_v52, %s1955_s7  ;;  %v470_v55 = vpack.c.bf16 %v384_v52, %v384_v52 }
 0x550   :  { %390 = vrot.lane.b32.xlu0 %v2118_v54, %s1954_s6 }
 0x553   :  { %472 = vrot.lane.b32.xlu1 %v470_v55, %s1955_s7 }
 0x5c1   :  { %v387_v56 = vpop.permute.xlu1 %386 }
 0x5c2   :  { %v391_v58 = vpop.permute.xlu0 %390 }
 0x5c3   :  { %v393_v59 = vsel %vm156_vm2, %v387_v56, %v391_v58 }
 0x5c4   :  { %v394_v60 = vpack.c.bf16 %v393_v59, %v393_v59  ;;  %v137_v59 = vadd.f32 %v2029_v21, %v2024_v17 }
 0x5c5   :  { %v473_v3 = vpop.permute.xlu1 %472 }
 0x5c6   :  { %1661 = vmatmul.mubr.msk.bf16.vlgmr.msra.gmra.mrb[8].mxu1 %vm236_vm3, %v394_v60  ;;  %1669 = vmatmul.mubr.msk.bf16.vlgmr.msra.gmra.mrb[12].mxu0 %vm156_vm2, %v473_v3 }
 0x5c7   :  { %1673 = vmatpush3.bf16.msra.mxu0 %v2038_v42  ;;  %1685 = vmatpush3.bf16.msra.mxu1 %v2000_v9 }
 0x5c8   :  { %1674 = vmatprep.subr.bf16.mxu0 %v1951_v0  ;;  %1686 = vmatprep.subr.bf16.mxu1 %v1951_v0 }
 0x5c9   :  { %1680 = vmatprep.mubr.msk.bf16.mxu0 %vm1952_vm0, %v1951_v0  ;;  %1688 = vmatprep.mubr.msk.bf16.mxu1 %vm1952_vm0, %v1951_v0 }
 0x5cb   :  { %1675 = vmatpush3.bf16.msra.mxu0 %v2053_v49  ;;  %1687 = vmatpush3.bf16.msra.mxu1 %v2009_v16 }
 0x5cc   :  { %1676 = vmatprep.subr.bf16.mxu0 %v1951_v0  ;;  %1692 = vmatprep.subr.bf16.mxu1 %v1951_v0 }
 0x5cf   :  { %1677 = vmatpush3.bf16.msra.mxu0 %v2061_v53 }
 0x5d0   :  { %1678 = vmatprep.subr.bf16.mxu0 %v1951_v0 }
 0x5d3   :  { %1679 = vmatpush3.bf16.msra.mxu0 %v2067_v57 }
 0x5d4   :  { %1704 = vmatprep.subr.bf16.mxu0 %v1951_v0 }
 0x699   :  { %v432_v5 = vpop.f32.mrb[8].mxu1  ;;  %v511_v6 = vpop.f32.mrb[12].mxu0 }
 0x69a   :  { %v433_v7 = vadd.f32 %v2102_v8, %v432_v5  ;;  %v517_v10 = vadd.f32 %v511_v6, %v134_v4  ;;  %v1662_v11 = vpop.f32.mrb[9].mxu1  ;;  %v1670_v12 = vpop.f32.mrb[13].mxu0 }
 0x69b   :  { %v435_v13 = vpop.f32.mrb[10].mxu1  ;;  %v514_v14 = vpop.f32.mrb[14].mxu0 }
 0x69c   :  { %v1502_v15 = vmul.f32 -1.442695, %v433_v7  ;;  %v1505_v19 = vmul.f32 -1.442695, %v517_v10  ;;  %v1663_v20 = vpop.f32.mrb[11].mxu1  ;;  %v1671_v23 = vpop.f32.mrb[15].mxu0 }
 0x69e   :  { %1821 = vpow2.f32 %v1502_v15 }
 0x69f   :  { %1823 = vpow2.f32 %v1505_v19 }
 0x6a8   :  { %v1822_v24 = vpop.eup %1821 }
 0x6a9   :  { %v1824_v25 = vpop.eup %1823  ;;  %v441_v26 = vadd.f32 1.0, %v1822_v24 }
 0x6aa   :  { %v521_v27 = vadd.f32 1.0, %v1824_v25 }
 0x6ab   :  { %1825 = vrcp.f32 %v441_v26 }
 0x6ac   :  { %1827 = vrcp.f32 %v521_v27 }
 0x6b5   :  { %v1826_v18 = vpop.eup %1825 }
 0x6b6   :  { %v1828_v28 = vpop.eup %1827  ;;  %v444_v22 = vmul.f32 2.0, %v1826_v18  ;;  %v446_v36 = vmul.f32 %v1826_v18, %v2112_v47 }
 0x6b7   :  { %v524_v29 = vmul.f32 2.0, %v1828_v28  ;;  %v526_v37 = vmul.f32 %v1828_v28, %v2110_v45 }
 0x6b8   :  { %v1503_v30 = vadd.f32 -1.0, %v444_v22 }
 0x6b9   :  { %v1506_v31 = vadd.f32 -1.0, %v524_v29 }
 0x6ba   :  { %448 = vrot.lane.b32.xlu0 %v1503_v30, %s1954_s6 }
 0x6bb   :  { %528 = vrot.lane.b32.xlu1 %v1506_v31, %s1954_s6 }
 0x72c   :  { %v449_v32 = vpop.permute.xlu0 %448 }
 0x72d   :  { %v529_v33 = vpop.permute.xlu1 %528  ;;  %v451_v34 = vmul.f32 %v1826_v18, %v449_v32 }
 0x72e   :  { %v531_v35 = vmul.f32 %v1828_v28, %v529_v33 }
 0x72f   :  { %453 = vrot.lane.b32.xlu0 %v451_v34, %s1955_s7 }
 0x730   :  { %533 = vrot.lane.b32.xlu1 %v531_v35, %s1955_s7 }
 0x7a1   :  { %v454_v39 = vpop.permute.xlu0 %453 }
 0x7a2   :  { %v534_v40 = vpop.permute.xlu1 %533  ;;  %v2152_v41 = vadd.f32 %v454_v39, %v446_v36 }
 0x7a3   :  { %v2154_v43 = vadd.f32 %v534_v40, %v526_v37 }
 0x7a4   :  { %1829 = vtanh.f32 %v2152_v41 }
 0x7a5   :  { %1831 = vtanh.f32 %v2154_v43 }
 0x7ae   :  { %v1830_v44 = vpop.eup %1829 }
 0x7af   :  { %v1832_v46 = vpop.eup %1831  ;;  %459 = vrot.lane.b32.xlu0 %v1830_v44, %s1954_s6 }
 0x7b0   :  { %539 = vrot.lane.b32.xlu1 %v1832_v46, %s1954_s6 }
 0x821   :  { %v460_v48 = vpop.permute.xlu0 %459 }
 0x822   :  { %v540_v47 = vpop.permute.xlu1 %539  ;;  %v2160_v50 = vmul.f32 %v1826_v18, %v460_v48 }
 0x823   :  { %v542_v45 = vmul.f32 %v1828_v28, %v540_v47 }
 0x824   :  { %548 = vrot.lane.b32.xlu1 %v2160_v50, %s1954_s6 }
 0x825   :  { %544 = vrot.lane.b32.xlu0 %v542_v45, %s1955_s7  ;;  %v628_v51 = vpack.c.bf16 %v542_v45, %v542_v45 }
 0x829   :  { %630 = vrot.lane.b32.xlu0 %v628_v51, %s1955_s7 }
 0x896   :  { %v549_v52 = vpop.permute.xlu1 %548 }
 0x897   :  { %v545_v38 = vpop.permute.xlu0 %544 }
 0x898   :  { %v551_v55 = vsel %vm156_vm2, %v545_v38, %v549_v52 }
 0x899   :  { %v552_v56 = vpack.c.bf16 %v551_v55, %v551_v55  ;;  %v142_v55 = vadd.f32 %v2024_v17, %v2075_v62 }
 0x89b   :  { %1681 = vmatmul.mubr.msk.bf16.vlgmr.msra.gmra.mrb[16].mxu0 %vm236_vm3, %v552_v56  ;;  %v631_v58 = vpop.permute.xlu0 %630 }
 0x89c   :  { %1689 = vmatmul.mubr.msk.bf16.vlgmr.msra.gmra.mrb[12].mxu1 %vm156_vm2, %v631_v58  ;;  %1705 = vmatpush3.bf16.msra.mxu0 %v2000_v9 }
 0x89d   :  { %1693 = vmatpush3.bf16.msra.mxu1 %v2038_v42  ;;  %1706 = vmatprep.subr.bf16.mxu0 %v1951_v0 }
 0x89e   :  { %1694 = vmatprep.subr.bf16.mxu1 %v1951_v0  ;;  %1700 = vmatprep.mubr.msk.bf16.mxu1 %vm1952_vm0, %v1951_v0 }
 0x89f   :  { %1708 = vmatprep.mubr.msk.bf16.mxu0 %vm1952_vm0, %v1951_v0 }
 0x8a0   :  { %1707 = vmatpush3.bf16.msra.mxu0 %v2009_v16 }
 0x8a1   :  { %1695 = vmatpush3.bf16.msra.mxu1 %v2053_v49  ;;  %1712 = vmatprep.subr.bf16.mxu0 %v1951_v0 }
 0x8a2   :  { %1696 = vmatprep.subr.bf16.mxu1 %v1951_v0 }
 0x8a5   :  { %1697 = vmatpush3.bf16.msra.mxu1 %v2061_v53 }
 0x8a6   :  { %1698 = vmatprep.subr.bf16.mxu1 %v1951_v0 }
 0x8a9   :  { %1699 = vmatpush3.bf16.msra.mxu1 %v2067_v57 }
 0x8aa   :  { %1724 = vmatprep.subr.bf16.mxu1 %v1951_v0 }
 0x96e   :  { %v590_v60 = vpop.f32.mrb[16].mxu0 }
 0x96f   :  { %v591_v3 = vadd.f32 %v2102_v8, %v590_v60  ;;  %v1682_v4 = vpop.f32.mrb[17].mxu0  ;;  %v669_v5 = vpop.f32.mrb[12].mxu1 }
 0x970   :  { %v675_v6 = vadd.f32 %v669_v5, %v137_v59  ;;  %v593_v7 = vpop.f32.mrb[18].mxu0  ;;  %v1690_v10 = vpop.f32.mrb[13].mxu1 }
 0x971   :  { %v1508_v11 = vmul.f32 -1.442695, %v591_v3  ;;  %v1683_v12 = vpop.f32.mrb[19].mxu0  ;;  %v672_v13 = vpop.f32.mrb[14].mxu1 }
 0x972   :  { %v1511_v14 = vmul.f32 -1.442695, %v675_v6  ;;  %v1691_v15 = vpop.f32.mrb[15].mxu1 }
 0x973   :  { %1833 = vpow2.f32 %v1508_v11 }
 0x974   :  { %1835 = vpow2.f32 %v1511_v14 }
 0x97d   :  { %v1834_v19 = vpop.eup %1833 }
 0x97e   :  { %v1836_v20 = vpop.eup %1835  ;;  %v599_v23 = vadd.f32 1.0, %v1834_v19 }
 0x97f   :  { %v679_v24 = vadd.f32 1.0, %v1836_v20 }
 0x980   :  { %1837 = vrcp.f32 %v599_v23 }
 0x981   :  { %1839 = vrcp.f32 %v679_v24 }
 0x98a   :  { %v1838_v21 = vpop.eup %1837 }
 0x98b   :  { %v1840_v25 = vpop.eup %1839  ;;  %v602_v26 = vmul.f32 2.0, %v1838_v21  ;;  %v604_v32 = vmul.f32 %v1838_v21, %v2152_v41 }
 0x98c   :  { %v682_v27 = vmul.f32 2.0, %v1840_v25  ;;  %v684_v34 = vmul.f32 %v1840_v25, %v2154_v43 }
 0x98d   :  { %v1509_v18 = vadd.f32 -1.0, %v602_v26 }
 0x98e   :  { %v1512_v28 = vadd.f32 -1.0, %v682_v27 }
 0x98f   :  { %606 = vrot.lane.b32.xlu1 %v1509_v18, %s1954_s6 }
 0x990   :  { %686 = vrot.lane.b32.xlu0 %v1512_v28, %s1954_s6 }
 0xa01   :  { %v607_v22 = vpop.permute.xlu1 %606 }
 0xa02   :  { %v609_v29 = vmul.f32 %v1838_v21, %v607_v22  ;;  %v687_v30 = vpop.permute.xlu0 %686 }
 0xa03   :  { %v689_v31 = vmul.f32 %v1840_v25, %v687_v30 }
 0xa04   :  { %611 = vrot.lane.b32.xlu1 %v609_v29, %s1955_s7 }
 0xa05   :  { %691 = vrot.lane.b32.xlu0 %v689_v31, %s1955_s7 }
 0xa76   :  { %v612_v33 = vpop.permute.xlu1 %611 }
 0xa77   :  { %v2194_v35 = vadd.f32 %v612_v33, %v604_v32  ;;  %v692_v36 = vpop.permute.xlu0 %691 }
 0xa78   :  { %v2196_v37 = vadd.f32 %v692_v36, %v684_v34 }
 0xa79   :  { %1841 = vtanh.f32 %v2194_v35 }
 0xa7a   :  { %1843 = vtanh.f32 %v2196_v37 }
 0xa83   :  { %v1842_v39 = vpop.eup %1841 }
 0xa84   :  { %v1844_v40 = vpop.eup %1843  ;;  %617 = vrot.lane.b32.xlu1 %v1842_v39, %s1954_s6 }
 0xa85   :  { %697 = vrot.lane.b32.xlu0 %v1844_v40, %s1954_s6 }
 0xaf6   :  { %v618_v44 = vpop.permute.xlu1 %617 }
 0xaf7   :  { %v2202_v41 = vmul.f32 %v1838_v21, %v618_v44  ;;  %v698_v46 = vpop.permute.xlu0 %697 }
 0xaf8   :  { %v700_v43 = vmul.f32 %v1840_v25, %v698_v46 }
 0xaf9   :  { %706 = vrot.lane.b32.xlu0 %v2202_v41, %s1954_s6 }
 0xafa   :  { %702 = vrot.lane.b32.xlu1 %v700_v43, %s1955_s7  ;;  %v786_v48 = vpack.c.bf16 %v700_v43, %v700_v43 }
 0xafe   :  { %788 = vrot.lane.b32.xlu1 %v786_v48, %s1955_s7 }
 0xb6b   :  { %v707_v47 = vpop.permute.xlu0 %706 }
 0xb6c   :  { %v703_v45 = vpop.permute.xlu1 %702 }
 0xb6d   :  { %v709_v51 = vsel %vm156_vm2, %v703_v45, %v707_v47 }
 0xb6e   :  { %v710_v52 = vpack.c.bf16 %v709_v51, %v709_v51  ;;  %v145_v51 = vadd.f32 %v2024_v17, %v2079_v2 }
 0xb70   :  { %v789_v38 = vpop.permute.xlu1 %788  ;;  %1701 = vmatmul.mubr.msk.bf16.vlgmr.msra.gmra.mrb[16].mxu1 %vm236_vm3, %v710_v52 }
 0xb71   :  { %1709 = vmatmul.mubr.msk.bf16.vlgmr.msra.gmra.mrb[20].mxu0 %vm156_vm2, %v789_v38  ;;  %1725 = vmatpush3.bf16.msra.mxu1 %v2000_v9 }
 0xb72   :  { %1713 = vmatpush3.bf16.msra.mxu0 %v2038_v42  ;;  %1726 = vmatprep.subr.bf16.mxu1 %v1951_v0 }
 0xb73   :  { %1714 = vmatprep.subr.bf16.mxu0 %v1951_v0  ;;  %1720 = vmatprep.mubr.msk.bf16.mxu0 %vm1952_vm0, %v1951_v0 }
 0xb74   :  { %1728 = vmatprep.mubr.msk.bf16.mxu1 %vm1952_vm0, %v1951_v0 }
 0xb75   :  { %1727 = vmatpush3.bf16.msra.mxu1 %v2009_v16 }
 0xb76   :  { %1715 = vmatpush3.bf16.msra.mxu0 %v2053_v49  ;;  %1732 = vmatprep.subr.bf16.mxu1 %v1951_v0 }
 0xb77   :  { %1716 = vmatprep.subr.bf16.mxu0 %v1951_v0 }
 0xb7a   :  { %1717 = vmatpush3.bf16.msra.mxu0 %v2061_v53 }
 0xb7b   :  { %1718 = vmatprep.subr.bf16.mxu0 %v1951_v0 }
 0xb7e   :  { %1719 = vmatpush3.bf16.msra.mxu0 %v2067_v57 }
 0xb7f   :  { %1744 = vmatprep.subr.bf16.mxu0 %v1951_v0 }
 0xc43   :  { %v748_v56 = vpop.f32.mrb[16].mxu1 }
 0xc44   :  { %v749_v58 = vadd.f32 %v2102_v8, %v748_v56  ;;  %v1702_v59 = vpop.f32.mrb[17].mxu1  ;;  %v827_v60 = vpop.f32.mrb[20].mxu0 }
 0xc45   :  { %v833_v3 = vadd.f32 %v827_v60, %v142_v55  ;;  %v751_v4 = vpop.f32.mrb[18].mxu1  ;;  %v1710_v5 = vpop.f32.mrb[21].mxu0 }
 0xc46   :  { %v1514_v6 = vmul.f32 -1.442695, %v749_v58  ;;  %v1703_v7 = vpop.f32.mrb[19].mxu1  ;;  %v830_v10 = vpop.f32.mrb[22].mxu0 }
 0xc47   :  { %v1517_v11 = vmul.f32 -1.442695, %v833_v3  ;;  %v1711_v12 = vpop.f32.mrb[23].mxu0 }
 0xc48   :  { %1845 = vpow2.f32 %v1514_v6 }
 0xc49   :  { %1847 = vpow2.f32 %v1517_v11 }
 0xc52   :  { %v1846_v13 = vpop.eup %1845 }
 0xc53   :  { %v1848_v14 = vpop.eup %1847  ;;  %v757_v15 = vadd.f32 1.0, %v1846_v13 }
 0xc54   :  { %v837_v19 = vadd.f32 1.0, %v1848_v14 }
 0xc55   :  { %1849 = vrcp.f32 %v757_v15 }
 0xc56   :  { %1851 = vrcp.f32 %v837_v19 }
 0xc5f   :  { %v1850_v62 = vpop.eup %1849 }
 0xc60   :  { %v1852_v20 = vpop.eup %1851  ;;  %v760_v23 = vmul.f32 2.0, %v1850_v62  ;;  %v762_v22 = vmul.f32 %v1850_v62, %v2194_v35 }
 0xc61   :  { %v840_v24 = vmul.f32 2.0, %v1852_v20  ;;  %v842_v30 = vmul.f32 %v1852_v20, %v2196_v37 }
 0xc62   :  { %v1515_v21 = vadd.f32 -1.0, %v760_v23 }
 0xc63   :  { %v1518_v25 = vadd.f32 -1.0, %v840_v24 }
 0xc64   :  { %764 = vrot.lane.b32.xlu0 %v1515_v21, %s1954_s6 }
 0xc65   :  { %844 = vrot.lane.b32.xlu1 %v1518_v25, %s1954_s6 }
 0xcd6   :  { %v765_v26 = vpop.permute.xlu0 %764 }
 0xcd7   :  { %v767_v27 = vmul.f32 %v1850_v62, %v765_v26  ;;  %v845_v18 = vpop.permute.xlu1 %844 }
 0xcd8   :  { %v847_v28 = vmul.f32 %v1852_v20, %v845_v18 }
 0xcd9   :  { %769 = vrot.lane.b32.xlu0 %v767_v27, %s1955_s7 }
 0xcda   :  { %849 = vrot.lane.b32.xlu1 %v847_v28, %s1955_s7 }
 0xd4b   :  { %v770_v29 = vpop.permute.xlu0 %769 }
 0xd4c   :  { %v2236_v31 = vadd.f32 %v770_v29, %v762_v22  ;;  %v850_v32 = vpop.permute.xlu1 %849 }
 0xd4d   :  { %v2238_v33 = vadd.f32 %v850_v32, %v842_v30 }
 0xd4e   :  { %1853 = vtanh.f32 %v2236_v31 }
 0xd4f   :  { %1855 = vtanh.f32 %v2238_v33 }
 0xd58   :  { %v1854_v34 = vpop.eup %1853 }
 0xd59   :  { %v1856_v36 = vpop.eup %1855  ;;  %775 = vrot.lane.b32.xlu0 %v1854_v34, %s1954_s6 }
 0xd5a   :  { %855 = vrot.lane.b32.xlu1 %v1856_v36, %s1954_s6 }
 0xdcb   :  { %v776_v39 = vpop.permute.xlu0 %775 }
 0xdcc   :  { %v2244_v35 = vmul.f32 %v1850_v62, %v776_v39  ;;  %v856_v40 = vpop.permute.xlu1 %855 }
 0xdcd   :  { %v858_v37 = vmul.f32 %v1852_v20, %v856_v40 }
 0xdce   :  { %864 = vrot.lane.b32.xlu1 %v2244_v35, %s1954_s6 }
 0xdcf   :  { %860 = vrot.lane.b32.xlu0 %v858_v37, %s1955_s7  ;;  %v944_v44 = vpack.c.bf16 %v858_v37, %v858_v37 }
 0xdd3   :  { %946 = vrot.lane.b32.xlu0 %v944_v44, %s1955_s7 }
 0xe40   :  { %v865_v46 = vpop.permute.xlu1 %864 }
 0xe41   :  { %v861_v43 = vpop.permute.xlu0 %860 }
 0xe42   :  { %v867_v48 = vsel %vm156_vm2, %v861_v43, %v865_v46 }
 0xe43   :  { %v868_v47 = vpack.c.bf16 %v867_v48, %v867_v48 }
 0xe45   :  { %1721 = vmatmul.mubr.msk.bf16.vlgmr.msra.gmra.mrb[24].mxu0 %vm236_vm3, %v868_v47  ;;  %v947_v45 = vpop.permute.xlu0 %946 }
 0xe46   :  { %1729 = vmatmul.mubr.msk.bf16.vlgmr.msra.gmra.mrb[20].mxu1 %vm156_vm2, %v947_v45  ;;  %1745 = vmatpush3.bf16.msra.mxu0 %v2000_v9 }
 0xe47   :  { %1733 = vmatpush3.bf16.msra.mxu1 %v2038_v42  ;;  %1746 = vmatprep.subr.bf16.mxu0 %v1951_v0 }
 0xe48   :  { %1734 = vmatprep.subr.bf16.mxu1 %v1951_v0  ;;  %1740 = vmatprep.mubr.msk.bf16.mxu1 %vm1952_vm0, %v1951_v0 }
 0xe49   :  { %1748 = vmatprep.mubr.msk.bf16.mxu0 %vm1952_vm0, %v1951_v0 }
 0xe4a   :  { %1747 = vmatpush3.bf16.msra.mxu0 %v2009_v16 }
 0xe4b   :  { %1735 = vmatpush3.bf16.msra.mxu1 %v2053_v49  ;;  %1752 = vmatprep.subr.bf16.mxu0 %v1951_v0 }
 0xe4c   :  { %1736 = vmatprep.subr.bf16.mxu1 %v1951_v0 }
 0xe4f   :  { %1737 = vmatpush3.bf16.msra.mxu1 %v2061_v53 }
 0xe50   :  { %1738 = vmatprep.subr.bf16.mxu1 %v1951_v0 }
 0xe53   :  { %1739 = vmatpush3.bf16.msra.mxu1 %v2067_v57 }
 0xe54   :  { %1764 = vmatprep.subr.bf16.mxu1 %v1951_v0 }
 0xf18   :  { %v906_v52 = vpop.f32.mrb[24].mxu0 }
 0xf19   :  { %v907_v38 = vadd.f32 %v2102_v8, %v906_v52  ;;  %v1722_v55 = vpop.f32.mrb[25].mxu0  ;;  %v985_v56 = vpop.f32.mrb[20].mxu1 }
 0xf1a   :  { %v991_v58 = vadd.f32 %v985_v56, %v145_v51  ;;  %v909_v59 = vpop.f32.mrb[26].mxu0  ;;  %v1730_v60 = vpop.f32.mrb[21].mxu1 }
 0xf1b   :  { %v1520_v3 = vmul.f32 -1.442695, %v907_v38  ;;  %v1723_v4 = vpop.f32.mrb[27].mxu0  ;;  %v988_v5 = vpop.f32.mrb[22].mxu1 }
 0xf1c   :  { %v1523_v6 = vmul.f32 -1.442695, %v991_v58  ;;  %v1731_v7 = vpop.f32.mrb[23].mxu1 }
 0xf1d   :  { %1857 = vpow2.f32 %v1520_v3 }
 0xf1e   :  { %1859 = vpow2.f32 %v1523_v6 }
 0xf27   :  { %v1858_v10 = vpop.eup %1857 }
 0xf28   :  { %v1860_v11 = vpop.eup %1859  ;;  %v915_v12 = vadd.f32 1.0, %v1858_v10 }
 0xf29   :  { %v995_v13 = vadd.f32 1.0, %v1860_v11 }
 0xf2a   :  { %1861 = vrcp.f32 %v915_v12 }
 0xf2b   :  { %1863 = vrcp.f32 %v995_v13 }
 0xf34   :  { %v1862_v2 = vpop.eup %1861 }
 0xf35   :  { %v1864_v14 = vpop.eup %1863  ;;  %v918_v15 = vmul.f32 2.0, %v1862_v2  ;;  %v920_v26 = vmul.f32 %v1862_v2, %v2236_v31 }
 0xf36   :  { %v998_v19 = vmul.f32 2.0, %v1864_v14  ;;  %v1000_v18 = vmul.f32 %v1864_v14, %v2238_v33 }
 0xf37   :  { %v1521_v62 = vadd.f32 -1.0, %v918_v15 }
 0xf38   :  { %v1524_v20 = vadd.f32 -1.0, %v998_v19 }
 0xf39   :  { %922 = vrot.lane.b32.xlu1 %v1521_v62, %s1954_s6 }
 0xf3a   :  { %1002 = vrot.lane.b32.xlu0 %v1524_v20, %s1954_s6 }
 0xfab   :  { %v923_v23 = vpop.permute.xlu1 %922 }
 0xfac   :  { %v925_v24 = vmul.f32 %v1862_v2, %v923_v23  ;;  %v1003_v21 = vpop.permute.xlu0 %1002 }
 0xfad   :  { %v1005_v25 = vmul.f32 %v1864_v14, %v1003_v21 }
 0xfae   :  { %927 = vrot.lane.b32.xlu1 %v925_v24, %s1955_s7 }
 0xfaf   :  { %1007 = vrot.lane.b32.xlu0 %v1005_v25, %s1955_s7 }
0x1020   :  { %v928_v27 = vpop.permute.xlu1 %927 }
0x1021   :  { %v2278_v28 = vadd.f32 %v928_v27, %v920_v26  ;;  %v1008_v22 = vpop.permute.xlu0 %1007 }
0x1022   :  { %v2280_v29 = vadd.f32 %v1008_v22, %v1000_v18 }
0x1023   :  { %1865 = vtanh.f32 %v2278_v28 }
0x1024   :  { %1867 = vtanh.f32 %v2280_v29 }
0x102d   :  { %v1866_v30 = vpop.eup %1865 }
0x102e   :  { %v1868_v32 = vpop.eup %1867  ;;  %933 = vrot.lane.b32.xlu1 %v1866_v30, %s1954_s6 }
0x102f   :  { %1013 = vrot.lane.b32.xlu0 %v1868_v32, %s1954_s6 }
0x10a0   :  { %v934_v34 = vpop.permute.xlu1 %933 }
0x10a1   :  { %v2286_v31 = vmul.f32 %v1862_v2, %v934_v34  ;;  %v1014_v36 = vpop.permute.xlu0 %1013 }
0x10a2   :  { %v1016_v33 = vmul.f32 %v1864_v14, %v1014_v36 }
0x10a3   :  { %1022 = vrot.lane.b32.xlu0 %v2286_v31, %s1954_s6 }
0x10a4   :  { %1018 = vrot.lane.b32.xlu1 %v1016_v33, %s1955_s7  ;;  %v1102_v39 = vpack.c.bf16 %v1016_v33, %v1016_v33 }
0x10a8   :  { %1104 = vrot.lane.b32.xlu1 %v1102_v39, %s1955_s7  ;;  %v1899_v39 = vld [vmem:[#allocation2 + $0x30] ss:$0 sm:$0xff] }
0x1115   :  { %v1023_v40 = vpop.permute.xlu0 %1022 }
0x1116   :  { %v1019_v37 = vpop.permute.xlu1 %1018 }
0x1117   :  { %v1025_v44 = vsel %vm156_vm2, %v1019_v37, %v1023_v40  ;;  %v153_v40 = vadd.f32 %v1899_v39, %v2077_v63 }
0x1118   :  { %v1026_v46 = vpack.c.bf16 %v1025_v44, %v1025_v44 }
0x111a   :  { %v1105_v43 = vpop.permute.xlu1 %1104  ;;  %1741 = vmatmul.mubr.msk.bf16.vlgmr.msra.gmra.mrb[24].mxu1 %vm236_vm3, %v1026_v46 }
0x111b   :  { %1749 = vmatmul.mubr.msk.bf16.vlgmr.msra.gmra.mrb[28].mxu0 %vm156_vm2, %v1105_v43  ;;  %1765 = vmatpush3.bf16.msra.mxu1 %v2000_v9  ;;  %v150_v9 = vadd.f32 %v2073_v61, %v2024_v17 }
0x111c   :  { %1753 = vmatpush3.bf16.msra.mxu0 %v2038_v42  ;;  %1766 = vmatprep.subr.bf16.mxu1 %v1951_v0 }
0x111d   :  { %1754 = vmatprep.subr.bf16.mxu0 %v1951_v0  ;;  %1760 = vmatprep.mubr.msk.bf16.mxu0 %vm1952_vm0, %v1951_v0 }
0x111e   :  { %1768 = vmatprep.mubr.msk.bf16.mxu1 %vm1952_vm0, %v1951_v0 }
0x111f   :  { %1767 = vmatpush3.bf16.msra.mxu1 %v2009_v16 }
0x1120   :  { %1755 = vmatpush3.bf16.msra.mxu0 %v2053_v49  ;;  %1772 = vmatprep.subr.bf16.mxu1 %v1951_v0 }
0x1121   :  { %1756 = vmatprep.subr.bf16.mxu0 %v1951_v0 }
0x1124   :  { %1757 = vmatpush3.bf16.msra.mxu0 %v2061_v53 }
0x1125   :  { %1758 = vmatprep.subr.bf16.mxu0 %v1951_v0 }
0x1128   :  { %1759 = vmatpush3.bf16.msra.mxu0 %v2067_v57 }
0x1129   :  { %1784 = vmatprep.subr.bf16.mxu0 %v1951_v0 }
0x11ed   :  { %v1064_v48 = vpop.f32.mrb[24].mxu1 }
0x11ee   :  { %v1065_v16 = vadd.f32 %v2102_v8, %v1064_v48  ;;  %v1742_v47 = vpop.f32.mrb[25].mxu1  ;;  %v1143_v45 = vpop.f32.mrb[28].mxu0 }
0x11ef   :  { %v1149_v51 = vadd.f32 %v1143_v45, %v150_v9  ;;  %v1067_v52 = vpop.f32.mrb[26].mxu1  ;;  %v1750_v38 = vpop.f32.mrb[29].mxu0 }
0x11f0   :  { %v1526_v55 = vmul.f32 -1.442695, %v1065_v16  ;;  %v1743_v56 = vpop.f32.mrb[27].mxu1  ;;  %v1146_v58 = vpop.f32.mrb[30].mxu0 }
0x11f1   :  { %v1529_v59 = vmul.f32 -1.442695, %v1149_v51  ;;  %v1751_v60 = vpop.f32.mrb[31].mxu0 }
0x11f2   :  { %1869 = vpow2.f32 %v1526_v55 }
0x11f3   :  { %1871 = vpow2.f32 %v1529_v59 }
0x11fc   :  { %v1870_v3 = vpop.eup %1869 }
0x11fd   :  { %v1872_v4 = vpop.eup %1871  ;;  %v1073_v5 = vadd.f32 1.0, %v1870_v3 }
0x11fe   :  { %v1153_v6 = vadd.f32 1.0, %v1872_v4 }
0x11ff   :  { %1873 = vrcp.f32 %v1073_v5 }
0x1200   :  { %1875 = vrcp.f32 %v1153_v6 }
0x1209   :  { %v1874_v17 = vpop.eup %1873 }
0x120a   :  { %v1876_v61 = vpop.eup %1875  ;;  %v1076_v7 = vmul.f32 2.0, %v1874_v17  ;;  %v1078_v19 = vmul.f32 %v1874_v17, %v2278_v28 }
0x120b   :  { %v1156_v10 = vmul.f32 2.0, %v1876_v61  ;;  %v1158_v20 = vmul.f32 %v1876_v61, %v2280_v29 }
0x120c   :  { %v1527_v11 = vadd.f32 -1.0, %v1076_v7 }
0x120d   :  { %v1530_v12 = vadd.f32 -1.0, %v1156_v10 }
0x120e   :  { %1080 = vrot.lane.b32.xlu0 %v1527_v11, %s1954_s6 }
0x120f   :  { %1160 = vrot.lane.b32.xlu1 %v1530_v12, %s1954_s6 }
0x1280   :  { %v1081_v13 = vpop.permute.xlu0 %1080 }
0x1281   :  { %v1083_v2 = vmul.f32 %v1874_v17, %v1081_v13  ;;  %v1161_v14 = vpop.permute.xlu1 %1160 }
0x1282   :  { %v1163_v15 = vmul.f32 %v1876_v61, %v1161_v14 }
0x1283   :  { %1085 = vrot.lane.b32.xlu0 %v1083_v2, %s1955_s7 }
0x1284   :  { %1165 = vrot.lane.b32.xlu1 %v1163_v15, %s1955_s7 }
0x12f5   :  { %v1086_v62 = vpop.permute.xlu0 %1085 }
0x12f6   :  { %v2320_v23 = vadd.f32 %v1086_v62, %v1078_v19  ;;  %v1166_v24 = vpop.permute.xlu1 %1165 }
0x12f7   :  { %v2322_v21 = vadd.f32 %v1166_v24, %v1158_v20 }
0x12f8   :  { %1877 = vtanh.f32 %v2320_v23 }
0x12f9   :  { %1879 = vtanh.f32 %v2322_v21 }
0x1302   :  { %v1878_v25 = vpop.eup %1877 }
0x1303   :  { %v1880_v26 = vpop.eup %1879  ;;  %1091 = vrot.lane.b32.xlu0 %v1878_v25, %s1954_s6 }
0x1304   :  { %1171 = vrot.lane.b32.xlu1 %v1880_v26, %s1954_s6 }
0x1375   :  { %v1092_v27 = vpop.permute.xlu0 %1091 }
0x1376   :  { %v2328_v18 = vmul.f32 %v1874_v17, %v1092_v27  ;;  %v1172_v28 = vpop.permute.xlu1 %1171 }
0x1377   :  { %v1174_v22 = vmul.f32 %v1876_v61, %v1172_v28 }
0x1378   :  { %1180 = vrot.lane.b32.xlu1 %v2328_v18, %s1954_s6 }
0x1379   :  { %1176 = vrot.lane.b32.xlu0 %v1174_v22, %s1955_s7  ;;  %v1260_v29 = vpack.c.bf16 %v1174_v22, %v1174_v22 }
0x137d   :  { %1262 = vrot.lane.b32.xlu0 %v1260_v29, %s1955_s7 }
0x13ea   :  { %v1181_v30 = vpop.permute.xlu1 %1180 }
0x13eb   :  { %v1177_v32 = vpop.permute.xlu0 %1176 }
0x13ec   :  { %v1183_v34 = vsel %vm156_vm2, %v1177_v32, %v1181_v30 }
0x13ed   :  { %v1184_v36 = vpack.c.bf16 %v1183_v34, %v1183_v34  ;;  %v30_v34 = vld [vmem:[%s2413_s1] sm:$0xff]  ;;  %s1956_s1 = smov [#allocation5]  }
0x13ee   :  { %s1477_s17 = sshll.u32 %s1956_s1, 4  ;;  %s1478_s17 = int_to_ptr.vmem [resolvable:$true] %s1477_s17 }
0x13ef   :  { %1761 = vmatmul.mubr.msk.bf16.vlgmr.msra.gmra.mrb[32].mxu0 %vm236_vm3, %v1184_v36  ;;  %v1263_v33 = vpop.permute.xlu0 %1262  ;;  %v1486_v36 = vadd.s32 4294967295, %v30_v34  ;;  %s1922_s18 = scalar_lea.vmem %s1478_s17, 128  ;;  %p1927_p9 = scmp.lt.s32.totalorder %s1478_s17, %s1478_s17 }
0x13f0   :  { %1769 = vmatmul.mubr.msk.bf16.vlgmr.msra.gmra.mrb[28].mxu1 %vm156_vm2, %v1263_v33  ;;  %1788 = vmatprep.mubr.msk.bf16.mxu0 %vm1952_vm0, %v1951_v0  ;;  %p1923_p8 = scmp.ne.s32.totalorder %s1478_s17, %s1922_s18  ;;  %p1928_p10 = scmp.lt.s32.totalorder %s1922_s18, %s1922_s18 }
0x13f1   :  { %1773 = vmatpush3.bf16.msra.mxu1 %v2038_v42  ;;  %1780 = vmatprep.mubr.msk.bf16.mxu1 %vm1952_vm0, %v1951_v0  ;;  %vm305_vm4 = vcmp.eq.s32.totalorder %v1486_v36, 0  ;;  %vm621_vm5 = vcmp.eq.s32.totalorder %v1486_v36, 2  ;;  %vm779_vm6 = vcmp.eq.s32.totalorder %v1486_v36, 3  ;;  %vm1095_vm7 = vcmp.eq.s32.totalorder %v1486_v36, 5 }
0x13f2   :  { %1774 = vmatprep.subr.bf16.mxu1 %v1951_v0  ;;  %vm1411_vm8 = vcmp.eq.s32.totalorder %v1486_v36, 7  ;;  %vm463_vm9 = vcmp.eq.s32.totalorder %v1486_v36, 1  ;;  %vm937_vm10 = vcmp.eq.s32.totalorder %v1486_v36, 4  ;;  %vm1253_vm11 = vcmp.eq.s32.totalorder %v1486_v36, 6  ;;  %p1929_p11 = por %p1928_p10, %p1927_p9 }
0x13f4   :  { %p1930_p12 = pnand %p1929_p11, %p1923_p8 }
0x13f5   :  { %1775 = vmatpush3.bf16.msra.mxu1 %v2053_v49 }
0x13f6   :  { %1776 = vmatprep.subr.bf16.mxu1 %v1951_v0 }
0x13f9   :  { %1777 = vmatpush3.bf16.msra.mxu1 %v2061_v53 }
0x13fa   :  { %1778 = vmatprep.subr.bf16.mxu1 %v1951_v0 }
0x13fd   :  { %1779 = vmatpush3.bf16.msra.mxu1 %v2067_v57 }
0x14c2   :  { %v1222_v37 = vpop.f32.mrb[32].mxu0 }
0x14c3   :  { %v1223_v42 = vadd.f32 %v2102_v8, %v1222_v37  ;;  %v1762_v44 = vpop.f32.mrb[33].mxu0  ;;  %v1301_v46 = vpop.f32.mrb[28].mxu1  ;;  %v622_v37 = vsel %vm621_vm5, 1, %v1953_v1  ;;  %vm1469_vm5 = vcmask 64512  }
0x14c4   :  { %v1307_v43 = vadd.f32 %v1301_v46, %v153_v40  ;;  %v1225_v9 = vpop.f32.mrb[34].mxu0  ;;  %v1770_v48 = vpop.f32.mrb[29].mxu1  ;;  %v1096_v44 = vsel %vm1095_vm7, 1, %v1953_v1  ;;  %v1412_v46 = vsel %vm1411_vm8, 1, %v1953_v1 }
0x14c5   :  { %v1532_v49 = vmul.f32 -1.442695, %v1223_v42  ;;  %v1763_v16 = vpop.f32.mrb[35].mxu0  ;;  %v1304_v47 = vpop.f32.mrb[30].mxu1  ;;  %v780_v42 = vsel %vm779_vm6, 1, %v1953_v1  ;;  %v464_v48 = vsel %vm463_vm9, 1, %v1953_v1 }
0x14c6   :  { %v1535_v45 = vmul.f32 -1.442695, %v1307_v43  ;;  %v1771_v53 = vpop.f32.mrb[31].mxu1  ;;  %v1254_v16 = vsel %vm1253_vm11, 1, %v1953_v1 }
0x14c7   :  { %1881 = vpow2.f32 %v1532_v49  ;;  %v938_v49 = vsel %vm937_vm10, 1, %v1953_v1 }
0x14c8   :  { %1883 = vpow2.f32 %v1535_v45 }
0x14d1   :  { %v1882_v51 = vpop.eup %1881 }
0x14d2   :  { %v1884_v57 = vpop.eup %1883  ;;  %v1231_v52 = vadd.f32 1.0, %v1882_v51  ;;  %v63_v51 = vld [vmem:[#allocation2 + $0x80] sm:$0xff] }
0x14d3   :  { %v1311_v38 = vadd.f32 1.0, %v1884_v57  ;;  %v64_v57 = vld [vmem:[#allocation2 + $0x88] sm:$0xff] }
0x14d4   :  { %1885 = vrcp.f32 %v1231_v52  ;;  %v65_v52 = vld [vmem:[#allocation2 + $0x90] sm:$0xff] }
0x14d5   :  { %1887 = vrcp.f32 %v1311_v38  ;;  %v67_v38 = vpack.c.bf16 %v64_v57, %v63_v51 }
0x14d7   :  { %1785 = vmatpush3.bf16.msra.mxu0 %v67_v38 }
0x14d8   :  { %1786 = vmatprep.subr.bf16.mxu0 %v1951_v0 }
0x14de   :  { %v1886_v63 = vpop.eup %1885 }
0x14df   :  { %v1888_v55 = vpop.eup %1887  ;;  %v1234_v56 = vmul.f32 2.0, %v1886_v63  ;;  %v1236_v17 = vmul.f32 %v1886_v63, %v2320_v23 }
0x14e0   :  { %v1314_v58 = vmul.f32 2.0, %v1888_v55  ;;  %v1316_v7 = vmul.f32 %v1888_v55, %v2322_v21 }
0x14e1   :  { %v1533_v59 = vadd.f32 -1.0, %v1234_v56 }
0x14e2   :  { %v1536_v60 = vadd.f32 -1.0, %v1314_v58 }
0x14e3   :  { %1238 = vrot.lane.b32.xlu1 %v1533_v59, %s1954_s6 }
0x14e4   :  { %1318 = vrot.lane.b32.xlu0 %v1536_v60, %s1954_s6 }
0x1555   :  { %v1239_v3 = vpop.permute.xlu1 %1238 }
0x1556   :  { %v1241_v4 = vmul.f32 %v1886_v63, %v1239_v3  ;;  %v1319_v5 = vpop.permute.xlu0 %1318 }
0x1557   :  { %v1321_v6 = vmul.f32 %v1888_v55, %v1319_v5 }
0x1558   :  { %1243 = vrot.lane.b32.xlu1 %v1241_v4, %s1955_s7 }
0x1559   :  { %1323 = vrot.lane.b32.xlu0 %v1321_v6, %s1955_s7 }
0x15ca   :  { %v1244_v61 = vpop.permute.xlu1 %1243 }
0x15cb   :  { %v2356_v10 = vadd.f32 %v1244_v61, %v1236_v17  ;;  %v1324_v11 = vpop.permute.xlu0 %1323 }
0x15cc   :  { %v1326_v12 = vadd.f32 %v1324_v11, %v1316_v7 }
0x15cd   :  { %1889 = vtanh.f32 %v2356_v10 }
0x15ce   :  { %1891 = vtanh.f32 %v1326_v12 }
0x15d7   :  { %v1890_v13 = vpop.eup %1889 }
0x15d8   :  { %v1892_v2 = vpop.eup %1891  ;;  %1249 = vrot.lane.b32.xlu1 %v1890_v13, %s1954_s6 }
0x15d9   :  { %1329 = vrot.lane.b32.xlu0 %v1892_v2, %s1954_s6  ;;  %v1540_v2 = vld [vmem:[#allocation2 + $0xa0] ss:$0 sm:$0xff] }
0x164a   :  { %v1250_v14 = vpop.permute.xlu1 %1249 }
0x164b   :  { %v2361_v15 = vmul.f32 %v1886_v63, %v1250_v14  ;;  %v1330_v19 = vpop.permute.xlu0 %1329  ;;  %v66_v63 = vld [vmem:[#allocation2 + $0x98] sm:$0xff] }
0x164c   :  { %v1332_v62 = vmul.f32 %v1888_v55, %v1330_v19  ;;  %v68_v55 = vpack.c.bf16 %v66_v63, %v65_v52 }
0x164d   :  { %1338 = vrot.lane.b32.xlu0 %v2361_v15, %s1954_s6 }
0x164e   :  { %1334 = vrot.lane.b32.xlu1 %v1332_v62, %s1955_s7  ;;  %1787 = vmatpush3.bf16.msra.mxu0 %v68_v55 }
0x16bf   :  { %v1339_v20 = vpop.permute.xlu0 %1338 }
0x16c0   :  { %v1335_v23 = vpop.permute.xlu1 %1334 }
0x16c1   :  { %v1341_v24 = vsel %vm156_vm2, %v1335_v23, %v1339_v20 }
0x16c2   :  { %v1342_v21 = vpack.c.bf16 %v1341_v24, %v1341_v24 }
0x16c4   :  { %1781 = vmatmul.mubr.msk.bf16.vlgmr.msra.gmra.mrb[32].mxu1 %vm236_vm3, %v1342_v21 }
0x1797   :  { %v1380_v25 = vpop.f32.mrb[32].mxu1 }
0x1798   :  { %v1381_v26 = vadd.f32 %v2102_v8, %v1380_v25  ;;  %v1782_v27 = vpop.f32.mrb[33].mxu1  ;;  %v306_v8 = vsel %vm305_vm4, 1, %v1953_v1 }
0x1799   :  { %v1383_v28 = vpop.f32.mrb[34].mxu1 }
0x179a   :  { %v1538_v22 = vmul.f32 -1.442695, %v1381_v26  ;;  %v1783_v29 = vpop.f32.mrb[35].mxu1 }
0x179c   :  { %1893 = vpow2.f32 %v1538_v22 }
0x17a6   :  { %v1894_v30 = vpop.eup %1893 }
0x17a7   :  { %v1389_v32 = vadd.f32 1.0, %v1894_v30 }
0x17a9   :  { %1895 = vrcp.f32 %v1389_v32 }
0x17b3   :  { %v2372_v33 = vpop.eup %1895 }
0x17b4   :  { %v1392_v39 = vmul.f32 2.0, %v2372_v33  ;;  %v1394_v47 = vmul.f32 %v2372_v33, %v2356_v10 }
0x17b6   :  { %v1539_v40 = vadd.f32 -1.0, %v1392_v39 }
0x17b8   :  { %1396 = vrot.lane.b32.xlu1 %v1539_v40, %s1954_s6 }
0x17bc   :  { %308 = vperm.xlu1 %1801, %v306_v8  }
0x17c0   :  { %624 = vperm.xlu1 %1801, %v622_v37  }
0x17c4   :  { %782 = vperm.xlu1 %1801, %v780_v42  }
0x17c8   :  { %1098 = vperm.xlu1 %1801, %v1096_v44  }
0x17cc   :  { %1414 = vperm.xlu1 %1801, %v1412_v46  }
0x182a   :  { %v1397_v43 = vpop.permute.xlu1 %1396 }
0x182b   :  { %v1399_v9 = vmul.f32 %v2372_v33, %v1397_v43 }
0x182d   :  { %1401 = vrot.lane.b32.xlu0 %v1399_v9, %s1955_s7 }
0x1831   :  { %466 = vperm.xlu0 %1802, %v464_v48  }
0x1835   :  { %940 = vperm.xlu0 %1802, %v938_v49  }
0x1839   :  { %1256 = vperm.xlu0 %1802, %v1254_v16  }
0x183b   :  { %v309_v1 = vpop.permute.xlu1 %308 }
0x183c   :  { %vm310_vm12 = vcmp.eq.s32.totalorder %v309_v1, 1 }
0x183d   :  { %v311_v60 = vsel %vm310_vm12, %v2118_v54, 0.0 }
0x183f   :  { %v625_v58 = vpop.permute.xlu1 %624 }
0x1840   :  { %vm626_vm14 = vcmp.eq.s32.totalorder %v625_v58, 1 }
0x1843   :  { %v783_v4 = vpop.permute.xlu1 %782 }
0x1844   :  { %vm784_vm15 = vcmp.eq.s32.totalorder %v783_v4, 1 }
0x1847   :  { %v1099_v17 = vpop.permute.xlu1 %1098 }
0x1848   :  { %vm1100_vm1 = vcmp.eq.s32.totalorder %v1099_v17, 1 }
0x184b   :  { %v1415_v10 = vpop.permute.xlu1 %1414 }
0x184c   :  { %vm1416_vm4 = vcmp.eq.s32.totalorder %v1415_v10, 1 }
0x189f   :  { %v1402_v45 = vpop.permute.xlu0 %1401 }
0x18a0   :  { %v1404_v53 = vadd.f32 %v1402_v45, %v1394_v47 }
0x18a2   :  { %1897 = vtanh.f32 %v1404_v53 }
0x18ac   :  { %v1898_v56 = vpop.eup %1897 }
0x18ad   :  { %1407 = vrot.lane.b32.xlu0 %v1898_v56, %s1954_s6 }
0x18b0   :  { %v467_v59 = vpop.permute.xlu0 %466 }
0x18b1   :  { %vm468_vm13 = vcmp.eq.s32.totalorder %v467_v59, 1 }
0x18b2   :  { %v469_v3 = vsel %vm468_vm13, %v2160_v50, %v311_v60 }
0x18b3   :  { %v627_v6 = vsel %vm626_vm14, %v2202_v41, %v469_v3 }
0x18b4   :  { %v941_v5 = vpop.permute.xlu0 %940  ;;  %v785_v0 = vsel %vm784_vm15, %v2244_v35, %v627_v6 }
0x18b5   :  { %vm942_vm0 = vcmp.eq.s32.totalorder %v941_v5, 1 }
0x18b6   :  { %v943_v7 = vsel %vm942_vm0, %v2286_v31, %v785_v0 }
0x18b7   :  { %v1101_v54 = vsel %vm1100_vm1, %v2328_v18, %v943_v7 }
0x18b8   :  { %v1257_v61 = vpop.permute.xlu0 %1256 }
0x18b9   :  { %vm1258_vm3 = vcmp.eq.s32.totalorder %v1257_v61, 1 }
0x18ba   :  { %v1259_v12 = vsel %vm1258_vm3, %v2361_v15, %v1101_v54 }
0x191f   :  { %v1408_v11 = vpop.permute.xlu0 %1407 }
0x1920   :  { %v1410_v50 = vmul.f32 %v2372_v33, %v1408_v11 }
0x1922   :  { %v1417_v41 = vsel %vm1416_vm4, %v1410_v50, %v1259_v12 }
0x1923   :  { %v1418_v13 = vpack.c.bf16 %v1417_v41, %v1417_v41 }
0x1925   :  { %1424 = vrot.lane.b32.xlu1 %v1418_v13, %s1955_s7 }
0x1997   :  { %v1425_v35 = vpop.permute.xlu1 %1424 }
0x1998   :  { %1789 = vmatmul.mubr.msk.bf16.vlgmr.msra.gmra.mrb[36].mxu0 %vm156_vm2, %v1425_v35 }
0x1a6b   :  { %v1463_v31 = vpop.f32.mrb[36].mxu0 }
0x1a6c   :  { %v1464_v14 = vadd.f32 %v1540_v2, %v1463_v31  ;;  %v1790_v19 = vpop.f32.mrb[37].mxu0 }
0x1a6d   :  { %v1466_v18 = vpop.f32.mrb[38].mxu0 }
0x1a6e   :  { %v1791_v62 = vpop.f32.mrb[39].mxu0  ;;  %1470 = vst.msk [vmem:[#allocation5] sm:$0xff] %vm1469_vm5, %v1464_v14 }
0x1a6f   :  { %1933 = shalt.err (!%p1930_p12)
}
0x1a70   :  { %s1934_s21 = scalar_lea.hbm %s2415_s3, 128 }
0x1a71   :  { %p1935_p13 = scmp.ne.s32.totalorder %s2415_s3, %s1934_s21  ;;  %p1938_p0 = scmp.lt.u32.totalorder %s1934_s21, %s2415_s3 }
0x1a73   :  { %p1940_p1 = pnand %p1938_p0, %p1935_p13 }
0x1a75   :  { %1943 = shalt.err (!%p1940_p1)
}
0x1a76   :  { %1480 = dma.vmem_to_hbm [thread:$0]  %s1478_s17, 128, %s2415_s3, [#allocation4]  }
0x1a77   :  { %1946 = dma.done.wait [#allocation4], 128  }
0x1a78   :  { %1947 = vsyncadd [#allocation4], 4294967168 }
0x1a79   :  { %1484 = vsyncpa [#allocation3], 1 }
0x1a7a   :  { %1485 = vsyncpa [#allocation4], 1 }

</bundles_post_ra>
